<compile_context>
chip_gen: v5e
topology: v5e:2x2
jax: 0.10.0
libtpu: 0.0.40
codegen_flags: <defaults>
</compile_context>

<pallas_src>
import functools

import jax
import jax.numpy as jnp
from jax import lax
from jax.experimental import pallas as pl
from jax.experimental.pallas import tpu as pltpu


# ----------------------------------------------------------------------------
# Fused forward kernel
# ----------------------------------------------------------------------------
def _gen_fused_kernel(*refs, nlayers, steps):
    out_ref = refs[-1]
    it = iter(refs[:-1])

    x_ref = next(it)          # (N, dx)
    s_ref = next(it)          # (N, dy)
    q_ref = next(it)          # (M, dx)
    npos_t_ref = next(it)     # (dx, K)   node positions, pre-transposed
    npos_sq_ref = next(it)    # (1, K)    ||node_k||^2

    def take_mlp():
        # first layer pre-split into (Wa, Wb) so cat(a,b)@W0 == a@Wa + b@Wb
        wa = next(it)
        wb = next(it)
        b0 = next(it)
        tail = [(next(it), next(it)) for _ in range(nlayers)]
        return (wa, wb, b0, tail)

    enc = take_mlp()
    blocks = []
    for _ in range(steps):
        msg = take_mlp()
        nod = take_mlp()
        blocks.append((msg, nod))
    dec = take_mlp()

    f32 = jnp.float32

    def mlp_split(a, b, mlp):
        wa, wb, b0, tail = mlp
        h = (jnp.dot(a, wa[...], preferred_element_type=f32)
             + jnp.dot(b, wb[...], preferred_element_type=f32)
             + b0[...])
        for w, bb in tail:
            h = jnp.maximum(h, 0.0)
            h = jnp.dot(h, w[...], preferred_element_type=f32) + bb[...]
        return h

    npos_t = npos_t_ref[...]
    npos_sq = npos_sq_ref[...]

    def soft_scores(pts):
        # softmax_k( -||pts - node_k||^2 )
        xx = jnp.sum(pts * pts, axis=-1, keepdims=True)                    # (R, 1)
        logits = (2.0 * jnp.dot(pts, npos_t, preferred_element_type=f32)
                  - xx - npos_sq)                                          # (R, K)
        m = jnp.max(logits, axis=-1, keepdims=True)
        e = jnp.exp(logits - m)
        return e * pl.reciprocal(jnp.sum(e, axis=-1, keepdims=True), approx=True)

    x = x_ref[...]
    s = s_ref[...]
    q = q_ref[...]

    # --- encoder + pooling onto latent graph nodes -------------------------
    scores_x = soft_scores(x)                                              # (N, K)
    emb = mlp_split(x, s, enc)                                             # (N, H)
    # scores.transpose(1,2).bmm(emb): contract over the point axis of both.
    lat = lax.dot_general(scores_x, emb, (((0,), (0,)), ((), ())),
                          preferred_element_type=f32)                      # (K, H)

    # --- message-passing blocks (bidirectional ring via sublane rolls) -----
    K = lat.shape[0]
    for msg_mlp, nod_mlp in blocks:
        nxt = pltpu.roll(lat, shift=K - 1, axis=0)       # nxt[k] = lat[(k+1) % K]
        # edge group A: sender k   -> receiver k+1   (recv feats = nxt, send = lat)
        # edge group B: sender k+1 -> receiver k     (recv feats = lat, send = nxt)
        m_a = mlp_split(nxt, lat, msg_mlp)                                 # (K, H)
        m_b = mlp_split(lat, nxt, msg_mlp)                                 # (K, H)
        # index_add over receivers: group A lands at k+1, group B at k.
        inbox = pltpu.roll(m_a, shift=1, axis=0) + m_b                     # (K, H)
        lat = lat + mlp_split(lat, inbox, nod_mlp)

    # --- query read-out + decoder ------------------------------------------
    scores_q = soft_scores(q)                                              # (M, K)
    z = jnp.dot(scores_q, lat, preferred_element_type=f32)                 # (M, H)
    out_ref[...] = mlp_split(z, q, dec)                                    # (M, d_out)


def gen_forward(params, x, s, q):
    B, N, dx = x.shape
    dy = s.shape[-1]
    M = q.shape[1]
    dim_out = params["dim_out"]
    nlayers = params["nlayers"]
    steps = params["steps"]

    shared = [params["node_pos_t"], params["node_pos_sq"]] + params["flat_weights"]
    flat_inputs = [x, s, q] + shared

    in_specs = [
        pl.BlockSpec((None, N, dx), lambda i: (i, 0, 0)),
        pl.BlockSpec((None, N, dy), lambda i: (i, 0, 0)),
        pl.BlockSpec((None, M, dx), lambda i: (i, 0, 0)),
    ]
    for arr in shared:                      # all shared arrays are 2-D, full-block
        in_specs.append(pl.BlockSpec(arr.shape, lambda i: (0, 0)))

    kernel = functools.partial(_gen_fused_kernel, nlayers=nlayers, steps=steps)
    return pl.pallas_call(
        kernel,
        out_shape=jax.ShapeDtypeStruct((B, M, dim_out), jnp.float32),
        grid=(B,),
        in_specs=in_specs,
        out_specs=pl.BlockSpec((None, M, dim_out), lambda i: (i, 0, 0)),
        compiler_params=pltpu.CompilerParams(dimension_semantics=("parallel",)),
    )(*flat_inputs)


# ----------------------------------------------------------------------------
# Parameter setup (plain JAX, done once)
# ----------------------------------------------------------------------------
def init_mlp(key, d_in, d_out, d_h, nlayers):
    dims = [d_in] + [d_h] * nlayers + [d_out]
    layers = []
    for i in range(len(dims) - 1):
        key, kw, kb = jax.random.split(key, 3)
        w = jax.random.normal(kw, (dims[i], dims[i + 1]), jnp.float32) / jnp.sqrt(
            float(dims[i])
        )
        b = 0.01 * jax.random.normal(kb, (1, dims[i + 1]), jnp.float32)
        layers.append((w, b))
    return layers


def split_first(layers, split):
    # flatten an MLP's params with its first-layer weight split at `split`
    (w0, b0) = layers[0]
    flat = [w0[:split], w0[split:], b0]
    for w, b in layers[1:]:
        flat += [w, b]
    return flat


def build_params(key, *, dim_x, dim_y, dim_h, dim_out, nlayers, steps, n_nodes):
    key, k_enc, k_dec, k_pos = jax.random.split(key, 4)
    node_pos = jax.random.normal(k_pos, (n_nodes, dim_x), jnp.float32)   # (K, dx)

    flat = []
    flat += split_first(init_mlp(k_enc, dim_x + dim_y, dim_h, dim_h, nlayers), dim_x)
    for _ in range(steps):  # share_blocks = False -> independent params
        key, k_m, k_n = jax.random.split(key, 3)
        flat += split_first(init_mlp(k_m, 2 * dim_h, dim_h, dim_h, nlayers), dim_h)
        flat += split_first(init_mlp(k_n, 2 * dim_h, dim_h, dim_h, nlayers), dim_h)
    flat += split_first(init_mlp(k_dec, dim_h + dim_x, dim_out, dim_h, nlayers), dim_h)

    return {
        "node_pos_t": jnp.transpose(node_pos),                               # (dx, K)
        "node_pos_sq": jnp.transpose(
            jnp.sum(node_pos * node_pos, axis=-1, keepdims=True)),           # (1, K)
        "flat_weights": flat,
        "nlayers": nlayers,
        "steps": steps,
        "dim_out": dim_out,
    }


if __name__ == "__main__":
    B, N, M = 2, 16, 16            # batch, context points, query points
    dim_x, dim_y = 4, 3
    dim_h, dim_out = 32, 2
    nlayers, steps, n_nodes = 2, 2, 8

    key = jax.random.PRNGKey(0)
    key, kx, ks_, kq = jax.random.split(key, 4)
    x = jax.random.normal(kx, (B, N, dim_x), jnp.float32)
    s = jax.random.normal(ks_, (B, N, dim_y), jnp.float32)
    q = jax.random.normal(kq, (B, M, dim_x), jnp.float32)

    params = build_params(
        key,
        dim_x=dim_x,
        dim_y=dim_y,
        dim_h=dim_h,
        dim_out=dim_out,
        nlayers=nlayers,
        steps=steps,
        n_nodes=n_nodes,
    )

    out = gen_forward(params, x, s, q)
    jax.block_until_ready(out)
    assert out.shape == (B, M, dim_out)
    print("KERNEL_OK")
</pallas_src>

<mosaic_0001>
module attributes {stable_mosaic.version = 11 : i64} {
  func.func @_gen_fused_kernel(%arg0: i32, %arg1: memref<1x16x4xf32, #tpu.memory_space<vmem>>, %arg2: memref<1x16x3xf32, #tpu.memory_space<vmem>>, %arg3: memref<1x16x4xf32, #tpu.memory_space<vmem>>, %arg4: memref<4x8xf32, #tpu.memory_space<vmem>>, %arg5: memref<1x8xf32, #tpu.memory_space<vmem>>, %arg6: memref<4x32xf32, #tpu.memory_space<vmem>>, %arg7: memref<3x32xf32, #tpu.memory_space<vmem>>, %arg8: memref<1x32xf32, #tpu.memory_space<vmem>>, %arg9: memref<32x32xf32, #tpu.memory_space<vmem>>, %arg10: memref<1x32xf32, #tpu.memory_space<vmem>>, %arg11: memref<32x32xf32, #tpu.memory_space<vmem>>, %arg12: memref<1x32xf32, #tpu.memory_space<vmem>>, %arg13: memref<32x32xf32, #tpu.memory_space<vmem>>, %arg14: memref<32x32xf32, #tpu.memory_space<vmem>>, %arg15: memref<1x32xf32, #tpu.memory_space<vmem>>, %arg16: memref<32x32xf32, #tpu.memory_space<vmem>>, %arg17: memref<1x32xf32, #tpu.memory_space<vmem>>, %arg18: memref<32x32xf32, #tpu.memory_space<vmem>>, %arg19: memref<1x32xf32, #tpu.memory_space<vmem>>, %arg20: memref<32x32xf32, #tpu.memory_space<vmem>>, %arg21: memref<32x32xf32, #tpu.memory_space<vmem>>, %arg22: memref<1x32xf32, #tpu.memory_space<vmem>>, %arg23: memref<32x32xf32, #tpu.memory_space<vmem>>, %arg24: memref<1x32xf32, #tpu.memory_space<vmem>>, %arg25: memref<32x32xf32, #tpu.memory_space<vmem>>, %arg26: memref<1x32xf32, #tpu.memory_space<vmem>>, %arg27: memref<32x32xf32, #tpu.memory_space<vmem>>, %arg28: memref<32x32xf32, #tpu.memory_space<vmem>>, %arg29: memref<1x32xf32, #tpu.memory_space<vmem>>, %arg30: memref<32x32xf32, #tpu.memory_space<vmem>>, %arg31: memref<1x32xf32, #tpu.memory_space<vmem>>, %arg32: memref<32x32xf32, #tpu.memory_space<vmem>>, %arg33: memref<1x32xf32, #tpu.memory_space<vmem>>, %arg34: memref<32x32xf32, #tpu.memory_space<vmem>>, %arg35: memref<32x32xf32, #tpu.memory_space<vmem>>, %arg36: memref<1x32xf32, #tpu.memory_space<vmem>>, %arg37: memref<32x32xf32, #tpu.memory_space<vmem>>, %arg38: memref<1x32xf32, #tpu.memory_space<vmem>>, %arg39: memref<32x32xf32, #tpu.memory_space<vmem>>, %arg40: memref<1x32xf32, #tpu.memory_space<vmem>>, %arg41: memref<32x32xf32, #tpu.memory_space<vmem>>, %arg42: memref<4x32xf32, #tpu.memory_space<vmem>>, %arg43: memref<1x32xf32, #tpu.memory_space<vmem>>, %arg44: memref<32x32xf32, #tpu.memory_space<vmem>>, %arg45: memref<1x32xf32, #tpu.memory_space<vmem>>, %arg46: memref<32x2xf32, #tpu.memory_space<vmem>>, %arg47: memref<1x2xf32, #tpu.memory_space<vmem>>, %arg48: memref<1x16x2xf32, #tpu.memory_space<vmem>>) attributes {dimension_semantics = [#tpu.dimension_semantics<parallel>], iteration_bounds = array<i64: 2>, scalar_prefetch = 0 : i64, scratch_operands = 0 : i64, tpu.core_type = #tpu.core_type<tc>, window_params = [{transform_indices = @transform_0, window_bounds = array<i64: 1, 16, 4>}, {transform_indices = @transform_1, window_bounds = array<i64: 1, 16, 3>}, {transform_indices = @transform_2, window_bounds = array<i64: 1, 16, 4>}, {pipeline_mode = #tpu.pipeline_mode<synchronous>, transform_indices = @transform_3, window_bounds = array<i64: 4, 8>}, {pipeline_mode = #tpu.pipeline_mode<synchronous>, transform_indices = @transform_4, window_bounds = array<i64: 1, 8>}, {pipeline_mode = #tpu.pipeline_mode<synchronous>, transform_indices = @transform_5, window_bounds = array<i64: 4, 32>}, {pipeline_mode = #tpu.pipeline_mode<synchronous>, transform_indices = @transform_6, window_bounds = array<i64: 3, 32>}, {pipeline_mode = #tpu.pipeline_mode<synchronous>, transform_indices = @transform_7, window_bounds = array<i64: 1, 32>}, {pipeline_mode = #tpu.pipeline_mode<synchronous>, transform_indices = @transform_8, window_bounds = array<i64: 32, 32>}, {pipeline_mode = #tpu.pipeline_mode<synchronous>, transform_indices = @transform_9, window_bounds = array<i64: 1, 32>}, {pipeline_mode = #tpu.pipeline_mode<synchronous>, transform_indices = @transform_10, window_bounds = array<i64: 32, 32>}, {pipeline_mode = #tpu.pipeline_mode<synchronous>, transform_indices = @transform_11, window_bounds = array<i64: 1, 32>}, {pipeline_mode = #tpu.pipeline_mode<synchronous>, transform_indices = @transform_12, window_bounds = array<i64: 32, 32>}, {pipeline_mode = #tpu.pipeline_mode<synchronous>, transform_indices = @transform_13, window_bounds = array<i64: 32, 32>}, {pipeline_mode = #tpu.pipeline_mode<synchronous>, transform_indices = @transform_14, window_bounds = array<i64: 1, 32>}, {pipeline_mode = #tpu.pipeline_mode<synchronous>, transform_indices = @transform_15, window_bounds = array<i64: 32, 32>}, {pipeline_mode = #tpu.pipeline_mode<synchronous>, transform_indices = @transform_16, window_bounds = array<i64: 1, 32>}, {pipeline_mode = #tpu.pipeline_mode<synchronous>, transform_indices = @transform_17, window_bounds = array<i64: 32, 32>}, {pipeline_mode = #tpu.pipeline_mode<synchronous>, transform_indices = @transform_18, window_bounds = array<i64: 1, 32>}, {pipeline_mode = #tpu.pipeline_mode<synchronous>, transform_indices = @transform_19, window_bounds = array<i64: 32, 32>}, {pipeline_mode = #tpu.pipeline_mode<synchronous>, transform_indices = @transform_20, window_bounds = array<i64: 32, 32>}, {pipeline_mode = #tpu.pipeline_mode<synchronous>, transform_indices = @transform_21, window_bounds = array<i64: 1, 32>}, {pipeline_mode = #tpu.pipeline_mode<synchronous>, transform_indices = @transform_22, window_bounds = array<i64: 32, 32>}, {pipeline_mode = #tpu.pipeline_mode<synchronous>, transform_indices = @transform_23, window_bounds = array<i64: 1, 32>}, {pipeline_mode = #tpu.pipeline_mode<synchronous>, transform_indices = @transform_24, window_bounds = array<i64: 32, 32>}, {pipeline_mode = #tpu.pipeline_mode<synchronous>, transform_indices = @transform_25, window_bounds = array<i64: 1, 32>}, {pipeline_mode = #tpu.pipeline_mode<synchronous>, transform_indices = @transform_26, window_bounds = array<i64: 32, 32>}, {pipeline_mode = #tpu.pipeline_mode<synchronous>, transform_indices = @transform_27, window_bounds = array<i64: 32, 32>}, {pipeline_mode = #tpu.pipeline_mode<synchronous>, transform_indices = @transform_28, window_bounds = array<i64: 1, 32>}, {pipeline_mode = #tpu.pipeline_mode<synchronous>, transform_indices = @transform_29, window_bounds = array<i64: 32, 32>}, {pipeline_mode = #tpu.pipeline_mode<synchronous>, transform_indices = @transform_30, window_bounds = array<i64: 1, 32>}, {pipeline_mode = #tpu.pipeline_mode<synchronous>, transform_indices = @transform_31, window_bounds = array<i64: 32, 32>}, {pipeline_mode = #tpu.pipeline_mode<synchronous>, transform_indices = @transform_32, window_bounds = array<i64: 1, 32>}, {pipeline_mode = #tpu.pipeline_mode<synchronous>, transform_indices = @transform_33, window_bounds = array<i64: 32, 32>}, {pipeline_mode = #tpu.pipeline_mode<synchronous>, transform_indices = @transform_34, window_bounds = array<i64: 32, 32>}, {pipeline_mode = #tpu.pipeline_mode<synchronous>, transform_indices = @transform_35, window_bounds = array<i64: 1, 32>}, {pipeline_mode = #tpu.pipeline_mode<synchronous>, transform_indices = @transform_36, window_bounds = array<i64: 32, 32>}, {pipeline_mode = #tpu.pipeline_mode<synchronous>, transform_indices = @transform_37, window_bounds = array<i64: 1, 32>}, {pipeline_mode = #tpu.pipeline_mode<synchronous>, transform_indices = @transform_38, window_bounds = array<i64: 32, 32>}, {pipeline_mode = #tpu.pipeline_mode<synchronous>, transform_indices = @transform_39, window_bounds = array<i64: 1, 32>}, {pipeline_mode = #tpu.pipeline_mode<synchronous>, transform_indices = @transform_40, window_bounds = array<i64: 32, 32>}, {pipeline_mode = #tpu.pipeline_mode<synchronous>, transform_indices = @transform_41, window_bounds = array<i64: 4, 32>}, {pipeline_mode = #tpu.pipeline_mode<synchronous>, transform_indices = @transform_42, window_bounds = array<i64: 1, 32>}, {pipeline_mode = #tpu.pipeline_mode<synchronous>, transform_indices = @transform_43, window_bounds = array<i64: 32, 32>}, {pipeline_mode = #tpu.pipeline_mode<synchronous>, transform_indices = @transform_44, window_bounds = array<i64: 1, 32>}, {pipeline_mode = #tpu.pipeline_mode<synchronous>, transform_indices = @transform_45, window_bounds = array<i64: 32, 2>}, {pipeline_mode = #tpu.pipeline_mode<synchronous>, transform_indices = @transform_46, window_bounds = array<i64: 1, 2>}, {transform_indices = @transform_47, window_bounds = array<i64: 1, 16, 2>}]} {
    %c0 = arith.constant 0 : index
    %c0_0 = arith.constant 0 : index
    %0 = vector.load %arg4[%c0, %c0_0] : memref<4x8xf32, #tpu.memory_space<vmem>>, vector<4x8xf32>
    %c0_1 = arith.constant 0 : index
    %c0_2 = arith.constant 0 : index
    %1 = vector.load %arg5[%c0_1, %c0_2] : memref<1x8xf32, #tpu.memory_space<vmem>>, vector<1x8xf32>
    %c0_3 = arith.constant 0 : index
    %c0_4 = arith.constant 0 : index
    %c0_5 = arith.constant 0 : index
    %2 = vector.load %arg1[%c0_3, %c0_4, %c0_5] : memref<1x16x4xf32, #tpu.memory_space<vmem>>, vector<1x16x4xf32>
    %3 = vector.shape_cast %2 : vector<1x16x4xf32> to vector<16x4xf32>
    %c0_6 = arith.constant 0 : index
    %c0_7 = arith.constant 0 : index
    %c0_8 = arith.constant 0 : index
    %4 = vector.load %arg2[%c0_6, %c0_7, %c0_8] : memref<1x16x3xf32, #tpu.memory_space<vmem>>, vector<1x16x3xf32>
    %5 = vector.shape_cast %4 : vector<1x16x3xf32> to vector<16x3xf32>
    %c0_9 = arith.constant 0 : index
    %c0_10 = arith.constant 0 : index
    %c0_11 = arith.constant 0 : index
    %6 = vector.load %arg3[%c0_9, %c0_10, %c0_11] : memref<1x16x4xf32, #tpu.memory_space<vmem>>, vector<1x16x4xf32>
    %7 = vector.shape_cast %6 : vector<1x16x4xf32> to vector<16x4xf32>
    %8 = arith.mulf %3, %3 : vector<16x4xf32>
    %cst = arith.constant dense<0.000000e+00> : vector<16xf32>
    %9 = vector.multi_reduction <add>, %8, %cst [1] : vector<16x4xf32> to vector<16xf32>
    %10 = vector.shape_cast %9 : vector<16xf32> to vector<16x1xf32>
    %cst_12 = arith.constant dense<0.000000e+00> : vector<16x8xf32>
    %11 = tpu.matmul %3, %0, %cst_12 {dimension_numbers = #tpu.dot_dimension_numbers<[1], [0], [0], [1], [0, 0, 1, 1], [], []>} : vector<16x4xf32>, vector<4x8xf32>, vector<16x8xf32> -> vector<16x8xf32>
    %cst_13 = arith.constant 2.000000e+00 : f32
    %12 = vector.broadcast %cst_13 : f32 to vector<16x8xf32>
    %13 = arith.mulf %12, %11 : vector<16x8xf32>
    %14 = vector.broadcast %10 : vector<16x1xf32> to vector<16x8xf32>
    %15 = arith.subf %13, %14 : vector<16x8xf32>
    %16 = vector.broadcast %1 : vector<1x8xf32> to vector<16x8xf32>
    %17 = arith.subf %15, %16 : vector<16x8xf32>
    %cst_14 = arith.constant dense<0xFF800000> : vector<16xf32>
    %18 = vector.multi_reduction <maximumf>, %17, %cst_14 [1] : vector<16x8xf32> to vector<16xf32>
    %19 = vector.shape_cast %18 : vector<16xf32> to vector<16x1xf32>
    %20 = vector.broadcast %19 : vector<16x1xf32> to vector<16x8xf32>
    %21 = arith.subf %17, %20 : vector<16x8xf32>
    %22 = math.exp %21 : vector<16x8xf32>
    %cst_15 = arith.constant dense<0.000000e+00> : vector<16xf32>
    %23 = vector.multi_reduction <add>, %22, %cst_15 [1] : vector<16x8xf32> to vector<16xf32>
    %24 = vector.shape_cast %23 : vector<16xf32> to vector<16x1xf32>
    %25 = tpu.reciprocal %24 {approx = true} : vector<16x1xf32> -> vector<16x1xf32>
    %26 = vector.broadcast %25 : vector<16x1xf32> to vector<16x8xf32>
    %27 = arith.mulf %22, %26 : vector<16x8xf32>
    %c0_16 = arith.constant 0 : index
    %c0_17 = arith.constant 0 : index
    %28 = vector.load %arg6[%c0_16, %c0_17] : memref<4x32xf32, #tpu.memory_space<vmem>>, vector<4x32xf32>
    %cst_18 = arith.constant dense<0.000000e+00> : vector<16x32xf32>
    %29 = tpu.matmul %3, %28, %cst_18 {dimension_numbers = #tpu.dot_dimension_numbers<[1], [0], [0], [1], [0, 0, 1, 1], [], []>} : vector<16x4xf32>, vector<4x32xf32>, vector<16x32xf32> -> vector<16x32xf32>
    %c0_19 = arith.constant 0 : index
    %c0_20 = arith.constant 0 : index
    %30 = vector.load %arg7[%c0_19, %c0_20] : memref<3x32xf32, #tpu.memory_space<vmem>>, vector<3x32xf32>
    %cst_21 = arith.constant dense<0.000000e+00> : vector<16x32xf32>
    %31 = tpu.matmul %5, %30, %cst_21 {dimension_numbers = #tpu.dot_dimension_numbers<[1], [0], [0], [1], [0, 0, 1, 1], [], []>} : vector<16x3xf32>, vector<3x32xf32>, vector<16x32xf32> -> vector<16x32xf32>
    %32 = arith.addf %29, %31 : vector<16x32xf32>
    %c0_22 = arith.constant 0 : index
    %c0_23 = arith.constant 0 : index
    %33 = vector.load %arg8[%c0_22, %c0_23] : memref<1x32xf32, #tpu.memory_space<vmem>>, vector<1x32xf32>
    %34 = vector.broadcast %33 : vector<1x32xf32> to vector<16x32xf32>
    %35 = arith.addf %32, %34 : vector<16x32xf32>
    %cst_24 = arith.constant 0.000000e+00 : f32
    %36 = vector.broadcast %cst_24 : f32 to vector<16x32xf32>
    %37 = arith.maximumf %35, %36 : vector<16x32xf32>
    %c0_25 = arith.constant 0 : index
    %c0_26 = arith.constant 0 : index
    %38 = vector.load %arg9[%c0_25, %c0_26] : memref<32x32xf32, #tpu.memory_space<vmem>>, vector<32x32xf32>
    %cst_27 = arith.constant dense<0.000000e+00> : vector<16x32xf32>
    %39 = tpu.matmul %37, %38, %cst_27 {dimension_numbers = #tpu.dot_dimension_numbers<[1], [0], [0], [1], [0, 0, 1, 1], [], []>} : vector<16x32xf32>, vector<32x32xf32>, vector<16x32xf32> -> vector<16x32xf32>
    %c0_28 = arith.constant 0 : index
    %c0_29 = arith.constant 0 : index
    %40 = vector.load %arg10[%c0_28, %c0_29] : memref<1x32xf32, #tpu.memory_space<vmem>>, vector<1x32xf32>
    %41 = vector.broadcast %40 : vector<1x32xf32> to vector<16x32xf32>
    %42 = arith.addf %39, %41 : vector<16x32xf32>
    %cst_30 = arith.constant 0.000000e+00 : f32
    %43 = vector.broadcast %cst_30 : f32 to vector<16x32xf32>
    %44 = arith.maximumf %42, %43 : vector<16x32xf32>
    %c0_31 = arith.constant 0 : index
    %c0_32 = arith.constant 0 : index
    %45 = vector.load %arg11[%c0_31, %c0_32] : memref<32x32xf32, #tpu.memory_space<vmem>>, vector<32x32xf32>
    %cst_33 = arith.constant dense<0.000000e+00> : vector<16x32xf32>
    %46 = tpu.matmul %44, %45, %cst_33 {dimension_numbers = #tpu.dot_dimension_numbers<[1], [0], [0], [1], [0, 0, 1, 1], [], []>} : vector<16x32xf32>, vector<32x32xf32>, vector<16x32xf32> -> vector<16x32xf32>
    %c0_34 = arith.constant 0 : index
    %c0_35 = arith.constant 0 : index
    %47 = vector.load %arg12[%c0_34, %c0_35] : memref<1x32xf32, #tpu.memory_space<vmem>>, vector<1x32xf32>
    %48 = vector.broadcast %47 : vector<1x32xf32> to vector<16x32xf32>
    %49 = arith.addf %46, %48 : vector<16x32xf32>
    %cst_36 = arith.constant dense<0.000000e+00> : vector<8x32xf32>
    %50 = tpu.matmul %27, %49, %cst_36 {dimension_numbers = #tpu.dot_dimension_numbers<[0], [0], [1], [1], [0, 1, 1, 1], [], []>} : vector<16x8xf32>, vector<16x32xf32>, vector<8x32xf32> -> vector<8x32xf32>
    %c7_i32 = arith.constant 7 : i32
    %51 = tpu.dynamic_rotate %50 by %c7_i32 dim 0 : vector<8x32xf32>, i32 -> vector<8x32xf32>
    %c0_37 = arith.constant 0 : index
    %c0_38 = arith.constant 0 : index
    %52 = vector.load %arg13[%c0_37, %c0_38] : memref<32x32xf32, #tpu.memory_space<vmem>>, vector<32x32xf32>
    %cst_39 = arith.constant dense<0.000000e+00> : vector<8x32xf32>
    %53 = tpu.matmul %51, %52, %cst_39 {dimension_numbers = #tpu.dot_dimension_numbers<[1], [0], [0], [1], [0, 0, 1, 1], [], []>} : vector<8x32xf32>, vector<32x32xf32>, vector<8x32xf32> -> vector<8x32xf32>
    %c0_40 = arith.constant 0 : index
    %c0_41 = arith.constant 0 : index
    %54 = vector.load %arg14[%c0_40, %c0_41] : memref<32x32xf32, #tpu.memory_space<vmem>>, vector<32x32xf32>
    %cst_42 = arith.constant dense<0.000000e+00> : vector<8x32xf32>
    %55 = tpu.matmul %50, %54, %cst_42 {dimension_numbers = #tpu.dot_dimension_numbers<[1], [0], [0], [1], [0, 0, 1, 1], [], []>} : vector<8x32xf32>, vector<32x32xf32>, vector<8x32xf32> -> vector<8x32xf32>
    %56 = arith.addf %53, %55 : vector<8x32xf32>
    %c0_43 = arith.constant 0 : index
    %c0_44 = arith.constant 0 : index
    %57 = vector.load %arg15[%c0_43, %c0_44] : memref<1x32xf32, #tpu.memory_space<vmem>>, vector<1x32xf32>
    %58 = vector.broadcast %57 : vector<1x32xf32> to vector<8x32xf32>
    %59 = arith.addf %56, %58 : vector<8x32xf32>
    %cst_45 = arith.constant 0.000000e+00 : f32
    %60 = vector.broadcast %cst_45 : f32 to vector<8x32xf32>
    %61 = arith.maximumf %59, %60 : vector<8x32xf32>
    %c0_46 = arith.constant 0 : index
    %c0_47 = arith.constant 0 : index
    %62 = vector.load %arg16[%c0_46, %c0_47] : memref<32x32xf32, #tpu.memory_space<vmem>>, vector<32x32xf32>
    %cst_48 = arith.constant dense<0.000000e+00> : vector<8x32xf32>
    %63 = tpu.matmul %61, %62, %cst_48 {dimension_numbers = #tpu.dot_dimension_numbers<[1], [0], [0], [1], [0, 0, 1, 1], [], []>} : vector<8x32xf32>, vector<32x32xf32>, vector<8x32xf32> -> vector<8x32xf32>
    %c0_49 = arith.constant 0 : index
    %c0_50 = arith.constant 0 : index
    %64 = vector.load %arg17[%c0_49, %c0_50] : memref<1x32xf32, #tpu.memory_space<vmem>>, vector<1x32xf32>
    %65 = vector.broadcast %64 : vector<1x32xf32> to vector<8x32xf32>
    %66 = arith.addf %63, %65 : vector<8x32xf32>
    %cst_51 = arith.constant 0.000000e+00 : f32
    %67 = vector.broadcast %cst_51 : f32 to vector<8x32xf32>
    %68 = arith.maximumf %66, %67 : vector<8x32xf32>
    %c0_52 = arith.constant 0 : index
    %c0_53 = arith.constant 0 : index
    %69 = vector.load %arg18[%c0_52, %c0_53] : memref<32x32xf32, #tpu.memory_space<vmem>>, vector<32x32xf32>
    %cst_54 = arith.constant dense<0.000000e+00> : vector<8x32xf32>
    %70 = tpu.matmul %68, %69, %cst_54 {dimension_numbers = #tpu.dot_dimension_numbers<[1], [0], [0], [1], [0, 0, 1, 1], [], []>} : vector<8x32xf32>, vector<32x32xf32>, vector<8x32xf32> -> vector<8x32xf32>
    %c0_55 = arith.constant 0 : index
    %c0_56 = arith.constant 0 : index
    %71 = vector.load %arg19[%c0_55, %c0_56] : memref<1x32xf32, #tpu.memory_space<vmem>>, vector<1x32xf32>
    %72 = vector.broadcast %71 : vector<1x32xf32> to vector<8x32xf32>
    %73 = arith.addf %70, %72 : vector<8x32xf32>
    %c0_57 = arith.constant 0 : index
    %c0_58 = arith.constant 0 : index
    %74 = vector.load %arg13[%c0_57, %c0_58] : memref<32x32xf32, #tpu.memory_space<vmem>>, vector<32x32xf32>
    %cst_59 = arith.constant dense<0.000000e+00> : vector<8x32xf32>
    %75 = tpu.matmul %50, %74, %cst_59 {dimension_numbers = #tpu.dot_dimension_numbers<[1], [0], [0], [1], [0, 0, 1, 1], [], []>} : vector<8x32xf32>, vector<32x32xf32>, vector<8x32xf32> -> vector<8x32xf32>
    %c0_60 = arith.constant 0 : index
    %c0_61 = arith.constant 0 : index
    %76 = vector.load %arg14[%c0_60, %c0_61] : memref<32x32xf32, #tpu.memory_space<vmem>>, vector<32x32xf32>
    %cst_62 = arith.constant dense<0.000000e+00> : vector<8x32xf32>
    %77 = tpu.matmul %51, %76, %cst_62 {dimension_numbers = #tpu.dot_dimension_numbers<[1], [0], [0], [1], [0, 0, 1, 1], [], []>} : vector<8x32xf32>, vector<32x32xf32>, vector<8x32xf32> -> vector<8x32xf32>
    %78 = arith.addf %75, %77 : vector<8x32xf32>
    %c0_63 = arith.constant 0 : index
    %c0_64 = arith.constant 0 : index
    %79 = vector.load %arg15[%c0_63, %c0_64] : memref<1x32xf32, #tpu.memory_space<vmem>>, vector<1x32xf32>
    %80 = vector.broadcast %79 : vector<1x32xf32> to vector<8x32xf32>
    %81 = arith.addf %78, %80 : vector<8x32xf32>
    %cst_65 = arith.constant 0.000000e+00 : f32
    %82 = vector.broadcast %cst_65 : f32 to vector<8x32xf32>
    %83 = arith.maximumf %81, %82 : vector<8x32xf32>
    %c0_66 = arith.constant 0 : index
    %c0_67 = arith.constant 0 : index
    %84 = vector.load %arg16[%c0_66, %c0_67] : memref<32x32xf32, #tpu.memory_space<vmem>>, vector<32x32xf32>
    %cst_68 = arith.constant dense<0.000000e+00> : vector<8x32xf32>
    %85 = tpu.matmul %83, %84, %cst_68 {dimension_numbers = #tpu.dot_dimension_numbers<[1], [0], [0], [1], [0, 0, 1, 1], [], []>} : vector<8x32xf32>, vector<32x32xf32>, vector<8x32xf32> -> vector<8x32xf32>
    %c0_69 = arith.constant 0 : index
    %c0_70 = arith.constant 0 : index
    %86 = vector.load %arg17[%c0_69, %c0_70] : memref<1x32xf32, #tpu.memory_space<vmem>>, vector<1x32xf32>
    %87 = vector.broadcast %86 : vector<1x32xf32> to vector<8x32xf32>
    %88 = arith.addf %85, %87 : vector<8x32xf32>
    %cst_71 = arith.constant 0.000000e+00 : f32
    %89 = vector.broadcast %cst_71 : f32 to vector<8x32xf32>
    %90 = arith.maximumf %88, %89 : vector<8x32xf32>
    %c0_72 = arith.constant 0 : index
    %c0_73 = arith.constant 0 : index
    %91 = vector.load %arg18[%c0_72, %c0_73] : memref<32x32xf32, #tpu.memory_space<vmem>>, vector<32x32xf32>
    %cst_74 = arith.constant dense<0.000000e+00> : vector<8x32xf32>
    %92 = tpu.matmul %90, %91, %cst_74 {dimension_numbers = #tpu.dot_dimension_numbers<[1], [0], [0], [1], [0, 0, 1, 1], [], []>} : vector<8x32xf32>, vector<32x32xf32>, vector<8x32xf32> -> vector<8x32xf32>
    %c0_75 = arith.constant 0 : index
    %c0_76 = arith.constant 0 : index
    %93 = vector.load %arg19[%c0_75, %c0_76] : memref<1x32xf32, #tpu.memory_space<vmem>>, vector<1x32xf32>
    %94 = vector.broadcast %93 : vector<1x32xf32> to vector<8x32xf32>
    %95 = arith.addf %92, %94 : vector<8x32xf32>
    %c1_i32 = arith.constant 1 : i32
    %96 = tpu.dynamic_rotate %73 by %c1_i32 dim 0 : vector<8x32xf32>, i32 -> vector<8x32xf32>
    %97 = arith.addf %96, %95 : vector<8x32xf32>
    %c0_77 = arith.constant 0 : index
    %c0_78 = arith.constant 0 : index
    %98 = vector.load %arg20[%c0_77, %c0_78] : memref<32x32xf32, #tpu.memory_space<vmem>>, vector<32x32xf32>
    %cst_79 = arith.constant dense<0.000000e+00> : vector<8x32xf32>
    %99 = tpu.matmul %50, %98, %cst_79 {dimension_numbers = #tpu.dot_dimension_numbers<[1], [0], [0], [1], [0, 0, 1, 1], [], []>} : vector<8x32xf32>, vector<32x32xf32>, vector<8x32xf32> -> vector<8x32xf32>
    %c0_80 = arith.constant 0 : index
    %c0_81 = arith.constant 0 : index
    %100 = vector.load %arg21[%c0_80, %c0_81] : memref<32x32xf32, #tpu.memory_space<vmem>>, vector<32x32xf32>
    %cst_82 = arith.constant dense<0.000000e+00> : vector<8x32xf32>
    %101 = tpu.matmul %97, %100, %cst_82 {dimension_numbers = #tpu.dot_dimension_numbers<[1], [0], [0], [1], [0, 0, 1, 1], [], []>} : vector<8x32xf32>, vector<32x32xf32>, vector<8x32xf32> -> vector<8x32xf32>
    %102 = arith.addf %99, %101 : vector<8x32xf32>
    %c0_83 = arith.constant 0 : index
    %c0_84 = arith.constant 0 : index
    %103 = vector.load %arg22[%c0_83, %c0_84] : memref<1x32xf32, #tpu.memory_space<vmem>>, vector<1x32xf32>
    %104 = vector.broadcast %103 : vector<1x32xf32> to vector<8x32xf32>
    %105 = arith.addf %102, %104 : vector<8x32xf32>
    %cst_85 = arith.constant 0.000000e+00 : f32
    %106 = vector.broadcast %cst_85 : f32 to vector<8x32xf32>
    %107 = arith.maximumf %105, %106 : vector<8x32xf32>
    %c0_86 = arith.constant 0 : index
    %c0_87 = arith.constant 0 : index
    %108 = vector.load %arg23[%c0_86, %c0_87] : memref<32x32xf32, #tpu.memory_space<vmem>>, vector<32x32xf32>
    %cst_88 = arith.constant dense<0.000000e+00> : vector<8x32xf32>
    %109 = tpu.matmul %107, %108, %cst_88 {dimension_numbers = #tpu.dot_dimension_numbers<[1], [0], [0], [1], [0, 0, 1, 1], [], []>} : vector<8x32xf32>, vector<32x32xf32>, vector<8x32xf32> -> vector<8x32xf32>
    %c0_89 = arith.constant 0 : index
    %c0_90 = arith.constant 0 : index
    %110 = vector.load %arg24[%c0_89, %c0_90] : memref<1x32xf32, #tpu.memory_space<vmem>>, vector<1x32xf32>
    %111 = vector.broadcast %110 : vector<1x32xf32> to vector<8x32xf32>
    %112 = arith.addf %109, %111 : vector<8x32xf32>
    %cst_91 = arith.constant 0.000000e+00 : f32
    %113 = vector.broadcast %cst_91 : f32 to vector<8x32xf32>
    %114 = arith.maximumf %112, %113 : vector<8x32xf32>
    %c0_92 = arith.constant 0 : index
    %c0_93 = arith.constant 0 : index
    %115 = vector.load %arg25[%c0_92, %c0_93] : memref<32x32xf32, #tpu.memory_space<vmem>>, vector<32x32xf32>
    %cst_94 = arith.constant dense<0.000000e+00> : vector<8x32xf32>
    %116 = tpu.matmul %114, %115, %cst_94 {dimension_numbers = #tpu.dot_dimension_numbers<[1], [0], [0], [1], [0, 0, 1, 1], [], []>} : vector<8x32xf32>, vector<32x32xf32>, vector<8x32xf32> -> vector<8x32xf32>
    %c0_95 = arith.constant 0 : index
    %c0_96 = arith.constant 0 : index
    %117 = vector.load %arg26[%c0_95, %c0_96] : memref<1x32xf32, #tpu.memory_space<vmem>>, vector<1x32xf32>
    %118 = vector.broadcast %117 : vector<1x32xf32> to vector<8x32xf32>
    %119 = arith.addf %116, %118 : vector<8x32xf32>
    %120 = arith.addf %50, %119 : vector<8x32xf32>
    %c7_i32_97 = arith.constant 7 : i32
    %121 = tpu.dynamic_rotate %120 by %c7_i32_97 dim 0 : vector<8x32xf32>, i32 -> vector<8x32xf32>
    %c0_98 = arith.constant 0 : index
    %c0_99 = arith.constant 0 : index
    %122 = vector.load %arg27[%c0_98, %c0_99] : memref<32x32xf32, #tpu.memory_space<vmem>>, vector<32x32xf32>
    %cst_100 = arith.constant dense<0.000000e+00> : vector<8x32xf32>
    %123 = tpu.matmul %121, %122, %cst_100 {dimension_numbers = #tpu.dot_dimension_numbers<[1], [0], [0], [1], [0, 0, 1, 1], [], []>} : vector<8x32xf32>, vector<32x32xf32>, vector<8x32xf32> -> vector<8x32xf32>
    %c0_101 = arith.constant 0 : index
    %c0_102 = arith.constant 0 : index
    %124 = vector.load %arg28[%c0_101, %c0_102] : memref<32x32xf32, #tpu.memory_space<vmem>>, vector<32x32xf32>
    %cst_103 = arith.constant dense<0.000000e+00> : vector<8x32xf32>
    %125 = tpu.matmul %120, %124, %cst_103 {dimension_numbers = #tpu.dot_dimension_numbers<[1], [0], [0], [1], [0, 0, 1, 1], [], []>} : vector<8x32xf32>, vector<32x32xf32>, vector<8x32xf32> -> vector<8x32xf32>
    %126 = arith.addf %123, %125 : vector<8x32xf32>
    %c0_104 = arith.constant 0 : index
    %c0_105 = arith.constant 0 : index
    %127 = vector.load %arg29[%c0_104, %c0_105] : memref<1x32xf32, #tpu.memory_space<vmem>>, vector<1x32xf32>
    %128 = vector.broadcast %127 : vector<1x32xf32> to vector<8x32xf32>
    %129 = arith.addf %126, %128 : vector<8x32xf32>
    %cst_106 = arith.constant 0.000000e+00 : f32
    %130 = vector.broadcast %cst_106 : f32 to vector<8x32xf32>
    %131 = arith.maximumf %129, %130 : vector<8x32xf32>
    %c0_107 = arith.constant 0 : index
    %c0_108 = arith.constant 0 : index
    %132 = vector.load %arg30[%c0_107, %c0_108] : memref<32x32xf32, #tpu.memory_space<vmem>>, vector<32x32xf32>
    %cst_109 = arith.constant dense<0.000000e+00> : vector<8x32xf32>
    %133 = tpu.matmul %131, %132, %cst_109 {dimension_numbers = #tpu.dot_dimension_numbers<[1], [0], [0], [1], [0, 0, 1, 1], [], []>} : vector<8x32xf32>, vector<32x32xf32>, vector<8x32xf32> -> vector<8x32xf32>
    %c0_110 = arith.constant 0 : index
    %c0_111 = arith.constant 0 : index
    %134 = vector.load %arg31[%c0_110, %c0_111] : memref<1x32xf32, #tpu.memory_space<vmem>>, vector<1x32xf32>
    %135 = vector.broadcast %134 : vector<1x32xf32> to vector<8x32xf32>
    %136 = arith.addf %133, %135 : vector<8x32xf32>
    %cst_112 = arith.constant 0.000000e+00 : f32
    %137 = vector.broadcast %cst_112 : f32 to vector<8x32xf32>
    %138 = arith.maximumf %136, %137 : vector<8x32xf32>
    %c0_113 = arith.constant 0 : index
    %c0_114 = arith.constant 0 : index
    %139 = vector.load %arg32[%c0_113, %c0_114] : memref<32x32xf32, #tpu.memory_space<vmem>>, vector<32x32xf32>
    %cst_115 = arith.constant dense<0.000000e+00> : vector<8x32xf32>
    %140 = tpu.matmul %138, %139, %cst_115 {dimension_numbers = #tpu.dot_dimension_numbers<[1], [0], [0], [1], [0, 0, 1, 1], [], []>} : vector<8x32xf32>, vector<32x32xf32>, vector<8x32xf32> -> vector<8x32xf32>
    %c0_116 = arith.constant 0 : index
    %c0_117 = arith.constant 0 : index
    %141 = vector.load %arg33[%c0_116, %c0_117] : memref<1x32xf32, #tpu.memory_space<vmem>>, vector<1x32xf32>
    %142 = vector.broadcast %141 : vector<1x32xf32> to vector<8x32xf32>
    %143 = arith.addf %140, %142 : vector<8x32xf32>
    %c0_118 = arith.constant 0 : index
    %c0_119 = arith.constant 0 : index
    %144 = vector.load %arg27[%c0_118, %c0_119] : memref<32x32xf32, #tpu.memory_space<vmem>>, vector<32x32xf32>
    %cst_120 = arith.constant dense<0.000000e+00> : vector<8x32xf32>
    %145 = tpu.matmul %120, %144, %cst_120 {dimension_numbers = #tpu.dot_dimension_numbers<[1], [0], [0], [1], [0, 0, 1, 1], [], []>} : vector<8x32xf32>, vector<32x32xf32>, vector<8x32xf32> -> vector<8x32xf32>
    %c0_121 = arith.constant 0 : index
    %c0_122 = arith.constant 0 : index
    %146 = vector.load %arg28[%c0_121, %c0_122] : memref<32x32xf32, #tpu.memory_space<vmem>>, vector<32x32xf32>
    %cst_123 = arith.constant dense<0.000000e+00> : vector<8x32xf32>
    %147 = tpu.matmul %121, %146, %cst_123 {dimension_numbers = #tpu.dot_dimension_numbers<[1], [0], [0], [1], [0, 0, 1, 1], [], []>} : vector<8x32xf32>, vector<32x32xf32>, vector<8x32xf32> -> vector<8x32xf32>
    %148 = arith.addf %145, %147 : vector<8x32xf32>
    %c0_124 = arith.constant 0 : index
    %c0_125 = arith.constant 0 : index
    %149 = vector.load %arg29[%c0_124, %c0_125] : memref<1x32xf32, #tpu.memory_space<vmem>>, vector<1x32xf32>
    %150 = vector.broadcast %149 : vector<1x32xf32> to vector<8x32xf32>
    %151 = arith.addf %148, %150 : vector<8x32xf32>
    %cst_126 = arith.constant 0.000000e+00 : f32
    %152 = vector.broadcast %cst_126 : f32 to vector<8x32xf32>
    %153 = arith.maximumf %151, %152 : vector<8x32xf32>
    %c0_127 = arith.constant 0 : index
    %c0_128 = arith.constant 0 : index
    %154 = vector.load %arg30[%c0_127, %c0_128] : memref<32x32xf32, #tpu.memory_space<vmem>>, vector<32x32xf32>
    %cst_129 = arith.constant dense<0.000000e+00> : vector<8x32xf32>
    %155 = tpu.matmul %153, %154, %cst_129 {dimension_numbers = #tpu.dot_dimension_numbers<[1], [0], [0], [1], [0, 0, 1, 1], [], []>} : vector<8x32xf32>, vector<32x32xf32>, vector<8x32xf32> -> vector<8x32xf32>
    %c0_130 = arith.constant 0 : index
    %c0_131 = arith.constant 0 : index
    %156 = vector.load %arg31[%c0_130, %c0_131] : memref<1x32xf32, #tpu.memory_space<vmem>>, vector<1x32xf32>
    %157 = vector.broadcast %156 : vector<1x32xf32> to vector<8x32xf32>
    %158 = arith.addf %155, %157 : vector<8x32xf32>
    %cst_132 = arith.constant 0.000000e+00 : f32
    %159 = vector.broadcast %cst_132 : f32 to vector<8x32xf32>
    %160 = arith.maximumf %158, %159 : vector<8x32xf32>
    %c0_133 = arith.constant 0 : index
    %c0_134 = arith.constant 0 : index
    %161 = vector.load %arg32[%c0_133, %c0_134] : memref<32x32xf32, #tpu.memory_space<vmem>>, vector<32x32xf32>
    %cst_135 = arith.constant dense<0.000000e+00> : vector<8x32xf32>
    %162 = tpu.matmul %160, %161, %cst_135 {dimension_numbers = #tpu.dot_dimension_numbers<[1], [0], [0], [1], [0, 0, 1, 1], [], []>} : vector<8x32xf32>, vector<32x32xf32>, vector<8x32xf32> -> vector<8x32xf32>
    %c0_136 = arith.constant 0 : index
    %c0_137 = arith.constant 0 : index
    %163 = vector.load %arg33[%c0_136, %c0_137] : memref<1x32xf32, #tpu.memory_space<vmem>>, vector<1x32xf32>
    %164 = vector.broadcast %163 : vector<1x32xf32> to vector<8x32xf32>
    %165 = arith.addf %162, %164 : vector<8x32xf32>
    %c1_i32_138 = arith.constant 1 : i32
    %166 = tpu.dynamic_rotate %143 by %c1_i32_138 dim 0 : vector<8x32xf32>, i32 -> vector<8x32xf32>
    %167 = arith.addf %166, %165 : vector<8x32xf32>
    %c0_139 = arith.constant 0 : index
    %c0_140 = arith.constant 0 : index
    %168 = vector.load %arg34[%c0_139, %c0_140] : memref<32x32xf32, #tpu.memory_space<vmem>>, vector<32x32xf32>
    %cst_141 = arith.constant dense<0.000000e+00> : vector<8x32xf32>
    %169 = tpu.matmul %120, %168, %cst_141 {dimension_numbers = #tpu.dot_dimension_numbers<[1], [0], [0], [1], [0, 0, 1, 1], [], []>} : vector<8x32xf32>, vector<32x32xf32>, vector<8x32xf32> -> vector<8x32xf32>
    %c0_142 = arith.constant 0 : index
    %c0_143 = arith.constant 0 : index
    %170 = vector.load %arg35[%c0_142, %c0_143] : memref<32x32xf32, #tpu.memory_space<vmem>>, vector<32x32xf32>
    %cst_144 = arith.constant dense<0.000000e+00> : vector<8x32xf32>
    %171 = tpu.matmul %167, %170, %cst_144 {dimension_numbers = #tpu.dot_dimension_numbers<[1], [0], [0], [1], [0, 0, 1, 1], [], []>} : vector<8x32xf32>, vector<32x32xf32>, vector<8x32xf32> -> vector<8x32xf32>
    %172 = arith.addf %169, %171 : vector<8x32xf32>
    %c0_145 = arith.constant 0 : index
    %c0_146 = arith.constant 0 : index
    %173 = vector.load %arg36[%c0_145, %c0_146] : memref<1x32xf32, #tpu.memory_space<vmem>>, vector<1x32xf32>
    %174 = vector.broadcast %173 : vector<1x32xf32> to vector<8x32xf32>
    %175 = arith.addf %172, %174 : vector<8x32xf32>
    %cst_147 = arith.constant 0.000000e+00 : f32
    %176 = vector.broadcast %cst_147 : f32 to vector<8x32xf32>
    %177 = arith.maximumf %175, %176 : vector<8x32xf32>
    %c0_148 = arith.constant 0 : index
    %c0_149 = arith.constant 0 : index
    %178 = vector.load %arg37[%c0_148, %c0_149] : memref<32x32xf32, #tpu.memory_space<vmem>>, vector<32x32xf32>
    %cst_150 = arith.constant dense<0.000000e+00> : vector<8x32xf32>
    %179 = tpu.matmul %177, %178, %cst_150 {dimension_numbers = #tpu.dot_dimension_numbers<[1], [0], [0], [1], [0, 0, 1, 1], [], []>} : vector<8x32xf32>, vector<32x32xf32>, vector<8x32xf32> -> vector<8x32xf32>
    %c0_151 = arith.constant 0 : index
    %c0_152 = arith.constant 0 : index
    %180 = vector.load %arg38[%c0_151, %c0_152] : memref<1x32xf32, #tpu.memory_space<vmem>>, vector<1x32xf32>
    %181 = vector.broadcast %180 : vector<1x32xf32> to vector<8x32xf32>
    %182 = arith.addf %179, %181 : vector<8x32xf32>
    %cst_153 = arith.constant 0.000000e+00 : f32
    %183 = vector.broadcast %cst_153 : f32 to vector<8x32xf32>
    %184 = arith.maximumf %182, %183 : vector<8x32xf32>
    %c0_154 = arith.constant 0 : index
    %c0_155 = arith.constant 0 : index
    %185 = vector.load %arg39[%c0_154, %c0_155] : memref<32x32xf32, #tpu.memory_space<vmem>>, vector<32x32xf32>
    %cst_156 = arith.constant dense<0.000000e+00> : vector<8x32xf32>
    %186 = tpu.matmul %184, %185, %cst_156 {dimension_numbers = #tpu.dot_dimension_numbers<[1], [0], [0], [1], [0, 0, 1, 1], [], []>} : vector<8x32xf32>, vector<32x32xf32>, vector<8x32xf32> -> vector<8x32xf32>
    %c0_157 = arith.constant 0 : index
    %c0_158 = arith.constant 0 : index
    %187 = vector.load %arg40[%c0_157, %c0_158] : memref<1x32xf32, #tpu.memory_space<vmem>>, vector<1x32xf32>
    %188 = vector.broadcast %187 : vector<1x32xf32> to vector<8x32xf32>
    %189 = arith.addf %186, %188 : vector<8x32xf32>
    %190 = arith.addf %120, %189 : vector<8x32xf32>
    %191 = arith.mulf %7, %7 : vector<16x4xf32>
    %cst_159 = arith.constant dense<0.000000e+00> : vector<16xf32>
    %192 = vector.multi_reduction <add>, %191, %cst_159 [1] : vector<16x4xf32> to vector<16xf32>
    %193 = vector.shape_cast %192 : vector<16xf32> to vector<16x1xf32>
    %cst_160 = arith.constant dense<0.000000e+00> : vector<16x8xf32>
    %194 = tpu.matmul %7, %0, %cst_160 {dimension_numbers = #tpu.dot_dimension_numbers<[1], [0], [0], [1], [0, 0, 1, 1], [], []>} : vector<16x4xf32>, vector<4x8xf32>, vector<16x8xf32> -> vector<16x8xf32>
    %cst_161 = arith.constant 2.000000e+00 : f32
    %195 = vector.broadcast %cst_161 : f32 to vector<16x8xf32>
    %196 = arith.mulf %195, %194 : vector<16x8xf32>
    %197 = vector.broadcast %193 : vector<16x1xf32> to vector<16x8xf32>
    %198 = arith.subf %196, %197 : vector<16x8xf32>
    %199 = vector.broadcast %1 : vector<1x8xf32> to vector<16x8xf32>
    %200 = arith.subf %198, %199 : vector<16x8xf32>
    %cst_162 = arith.constant dense<0xFF800000> : vector<16xf32>
    %201 = vector.multi_reduction <maximumf>, %200, %cst_162 [1] : vector<16x8xf32> to vector<16xf32>
    %202 = vector.shape_cast %201 : vector<16xf32> to vector<16x1xf32>
    %203 = vector.broadcast %202 : vector<16x1xf32> to vector<16x8xf32>
    %204 = arith.subf %200, %203 : vector<16x8xf32>
    %205 = math.exp %204 : vector<16x8xf32>
    %cst_163 = arith.constant dense<0.000000e+00> : vector<16xf32>
    %206 = vector.multi_reduction <add>, %205, %cst_163 [1] : vector<16x8xf32> to vector<16xf32>
    %207 = vector.shape_cast %206 : vector<16xf32> to vector<16x1xf32>
    %208 = tpu.reciprocal %207 {approx = true} : vector<16x1xf32> -> vector<16x1xf32>
    %209 = vector.broadcast %208 : vector<16x1xf32> to vector<16x8xf32>
    %210 = arith.mulf %205, %209 : vector<16x8xf32>
    %cst_164 = arith.constant dense<0.000000e+00> : vector<16x32xf32>
    %211 = tpu.matmul %210, %190, %cst_164 {dimension_numbers = #tpu.dot_dimension_numbers<[1], [0], [0], [1], [0, 0, 1, 1], [], []>} : vector<16x8xf32>, vector<8x32xf32>, vector<16x32xf32> -> vector<16x32xf32>
    %c0_165 = arith.constant 0 : index
    %c0_166 = arith.constant 0 : index
    %212 = vector.load %arg41[%c0_165, %c0_166] : memref<32x32xf32, #tpu.memory_space<vmem>>, vector<32x32xf32>
    %cst_167 = arith.constant dense<0.000000e+00> : vector<16x32xf32>
    %213 = tpu.matmul %211, %212, %cst_167 {dimension_numbers = #tpu.dot_dimension_numbers<[1], [0], [0], [1], [0, 0, 1, 1], [], []>} : vector<16x32xf32>, vector<32x32xf32>, vector<16x32xf32> -> vector<16x32xf32>
    %c0_168 = arith.constant 0 : index
    %c0_169 = arith.constant 0 : index
    %214 = vector.load %arg42[%c0_168, %c0_169] : memref<4x32xf32, #tpu.memory_space<vmem>>, vector<4x32xf32>
    %cst_170 = arith.constant dense<0.000000e+00> : vector<16x32xf32>
    %215 = tpu.matmul %7, %214, %cst_170 {dimension_numbers = #tpu.dot_dimension_numbers<[1], [0], [0], [1], [0, 0, 1, 1], [], []>} : vector<16x4xf32>, vector<4x32xf32>, vector<16x32xf32> -> vector<16x32xf32>
    %216 = arith.addf %213, %215 : vector<16x32xf32>
    %c0_171 = arith.constant 0 : index
    %c0_172 = arith.constant 0 : index
    %217 = vector.load %arg43[%c0_171, %c0_172] : memref<1x32xf32, #tpu.memory_space<vmem>>, vector<1x32xf32>
    %218 = vector.broadcast %217 : vector<1x32xf32> to vector<16x32xf32>
    %219 = arith.addf %216, %218 : vector<16x32xf32>
    %cst_173 = arith.constant 0.000000e+00 : f32
    %220 = vector.broadcast %cst_173 : f32 to vector<16x32xf32>
    %221 = arith.maximumf %219, %220 : vector<16x32xf32>
    %c0_174 = arith.constant 0 : index
    %c0_175 = arith.constant 0 : index
    %222 = vector.load %arg44[%c0_174, %c0_175] : memref<32x32xf32, #tpu.memory_space<vmem>>, vector<32x32xf32>
    %cst_176 = arith.constant dense<0.000000e+00> : vector<16x32xf32>
    %223 = tpu.matmul %221, %222, %cst_176 {dimension_numbers = #tpu.dot_dimension_numbers<[1], [0], [0], [1], [0, 0, 1, 1], [], []>} : vector<16x32xf32>, vector<32x32xf32>, vector<16x32xf32> -> vector<16x32xf32>
    %c0_177 = arith.constant 0 : index
    %c0_178 = arith.constant 0 : index
    %224 = vector.load %arg45[%c0_177, %c0_178] : memref<1x32xf32, #tpu.memory_space<vmem>>, vector<1x32xf32>
    %225 = vector.broadcast %224 : vector<1x32xf32> to vector<16x32xf32>
    %226 = arith.addf %223, %225 : vector<16x32xf32>
    %cst_179 = arith.constant 0.000000e+00 : f32
    %227 = vector.broadcast %cst_179 : f32 to vector<16x32xf32>
    %228 = arith.maximumf %226, %227 : vector<16x32xf32>
    %c0_180 = arith.constant 0 : index
    %c0_181 = arith.constant 0 : index
    %229 = vector.load %arg46[%c0_180, %c0_181] : memref<32x2xf32, #tpu.memory_space<vmem>>, vector<32x2xf32>
    %cst_182 = arith.constant dense<0.000000e+00> : vector<16x2xf32>
    %230 = tpu.matmul %228, %229, %cst_182 {dimension_numbers = #tpu.dot_dimension_numbers<[1], [0], [0], [1], [0, 0, 1, 1], [], []>} : vector<16x32xf32>, vector<32x2xf32>, vector<16x2xf32> -> vector<16x2xf32>
    %c0_183 = arith.constant 0 : index
    %c0_184 = arith.constant 0 : index
    %231 = vector.load %arg47[%c0_183, %c0_184] : memref<1x2xf32, #tpu.memory_space<vmem>>, vector<1x2xf32>
    %232 = vector.broadcast %231 : vector<1x2xf32> to vector<16x2xf32>
    %233 = arith.addf %230, %232 : vector<16x2xf32>
    %c0_185 = arith.constant 0 : index
    %c0_186 = arith.constant 0 : index
    %c0_187 = arith.constant 0 : index
    %234 = vector.load %arg48[%c0_185, %c0_186, %c0_187] : memref<1x16x2xf32, #tpu.memory_space<vmem>>, vector<1x16x2xf32>
    %235 = vector.shape_cast %234 : vector<1x16x2xf32> to vector<16x2xf32>
    %236 = vector.shape_cast %233 : vector<16x2xf32> to vector<1x16x2xf32>
    tpu.vector_store %arg48[%c0_185, %c0_186, %c0_187], %236 {strides = array<i32>} : memref<1x16x2xf32, #tpu.memory_space<vmem>>, vector<1x16x2xf32>,
    return
  }
  func.func @transform_0(%arg0: i32) -> (i32, i32, i32) {
    %c0_i32 = arith.constant 0 : i32
    %c0_i32_0 = arith.constant 0 : i32
    %c0_i32_1 = arith.constant 0 : i32
    return %arg0, %c0_i32, %c0_i32_0 : i32, i32, i32
  }
  func.func @transform_1(%arg0: i32) -> (i32, i32, i32) {
    %c0_i32 = arith.constant 0 : i32
    %c0_i32_0 = arith.constant 0 : i32
    %c0_i32_1 = arith.constant 0 : i32
    return %arg0, %c0_i32, %c0_i32_0 : i32, i32, i32
  }
  func.func @transform_2(%arg0: i32) -> (i32, i32, i32) {
    %c0_i32 = arith.constant 0 : i32
    %c0_i32_0 = arith.constant 0 : i32
    %c0_i32_1 = arith.constant 0 : i32
    return %arg0, %c0_i32, %c0_i32_0 : i32, i32, i32
  }
  func.func @transform_3(%arg0: i32) -> (i32, i32) {
    %c0_i32 = arith.constant 0 : i32
    %c0_i32_0 = arith.constant 0 : i32
    %c0_i32_1 = arith.constant 0 : i32
    return %c0_i32, %c0_i32_0 : i32, i32
  }
  func.func @transform_4(%arg0: i32) -> (i32, i32) {
    %c0_i32 = arith.constant 0 : i32
    %c0_i32_0 = arith.constant 0 : i32
    %c0_i32_1 = arith.constant 0 : i32
    return %c0_i32, %c0_i32_0 : i32, i32
  }
  func.func @transform_5(%arg0: i32) -> (i32, i32) {
    %c0_i32 = arith.constant 0 : i32
    %c0_i32_0 = arith.constant 0 : i32
    %c0_i32_1 = arith.constant 0 : i32
    return %c0_i32, %c0_i32_0 : i32, i32
  }
  func.func @transform_6(%arg0: i32) -> (i32, i32) {
    %c0_i32 = arith.constant 0 : i32
    %c0_i32_0 = arith.constant 0 : i32
    %c0_i32_1 = arith.constant 0 : i32
    return %c0_i32, %c0_i32_0 : i32, i32
  }
  func.func @transform_7(%arg0: i32) -> (i32, i32) {
    %c0_i32 = arith.constant 0 : i32
    %c0_i32_0 = arith.constant 0 : i32
    %c0_i32_1 = arith.constant 0 : i32
    return %c0_i32, %c0_i32_0 : i32, i32
  }
  func.func @transform_8(%arg0: i32) -> (i32, i32) {
    %c0_i32 = arith.constant 0 : i32
    %c0_i32_0 = arith.constant 0 : i32
    %c0_i32_1 = arith.constant 0 : i32
    return %c0_i32, %c0_i32_0 : i32, i32
  }
  func.func @transform_9(%arg0: i32) -> (i32, i32) {
    %c0_i32 = arith.constant 0 : i32
    %c0_i32_0 = arith.constant 0 : i32
    %c0_i32_1 = arith.constant 0 : i32
    return %c0_i32, %c0_i32_0 : i32, i32
  }
  func.func @transform_10(%arg0: i32) -> (i32, i32) {
    %c0_i32 = arith.constant 0 : i32
    %c0_i32_0 = arith.constant 0 : i32
    %c0_i32_1 = arith.constant 0 : i32
    return %c0_i32, %c0_i32_0 : i32, i32
  }
  func.func @transform_11(%arg0: i32) -> (i32, i32) {
    %c0_i32 = arith.constant 0 : i32
    %c0_i32_0 = arith.constant 0 : i32
    %c0_i32_1 = arith.constant 0 : i32
    return %c0_i32, %c0_i32_0 : i32, i32
  }
  func.func @transform_12(%arg0: i32) -> (i32, i32) {
    %c0_i32 = arith.constant 0 : i32
    %c0_i32_0 = arith.constant 0 : i32
    %c0_i32_1 = arith.constant 0 : i32
    return %c0_i32, %c0_i32_0 : i32, i32
  }
  func.func @transform_13(%arg0: i32) -> (i32, i32) {
    %c0_i32 = arith.constant 0 : i32
    %c0_i32_0 = arith.constant 0 : i32
    %c0_i32_1 = arith.constant 0 : i32
    return %c0_i32, %c0_i32_0 : i32, i32
  }
  func.func @transform_14(%arg0: i32) -> (i32, i32) {
    %c0_i32 = arith.constant 0 : i32
    %c0_i32_0 = arith.constant 0 : i32
    %c0_i32_1 = arith.constant 0 : i32
    return %c0_i32, %c0_i32_0 : i32, i32
  }
  func.func @transform_15(%arg0: i32) -> (i32, i32) {
    %c0_i32 = arith.constant 0 : i32
    %c0_i32_0 = arith.constant 0 : i32
    %c0_i32_1 = arith.constant 0 : i32
    return %c0_i32, %c0_i32_0 : i32, i32
  }
  func.func @transform_16(%arg0: i32) -> (i32, i32) {
    %c0_i32 = arith.constant 0 : i32
    %c0_i32_0 = arith.constant 0 : i32
    %c0_i32_1 = arith.constant 0 : i32
    return %c0_i32, %c0_i32_0 : i32, i32
  }
  func.func @transform_17(%arg0: i32) -> (i32, i32) {
    %c0_i32 = arith.constant 0 : i32
    %c0_i32_0 = arith.constant 0 : i32
    %c0_i32_1 = arith.constant 0 : i32
    return %c0_i32, %c0_i32_0 : i32, i32
  }
  func.func @transform_18(%arg0: i32) -> (i32, i32) {
    %c0_i32 = arith.constant 0 : i32
    %c0_i32_0 = arith.constant 0 : i32
    %c0_i32_1 = arith.constant 0 : i32
    return %c0_i32, %c0_i32_0 : i32, i32
  }
  func.func @transform_19(%arg0: i32) -> (i32, i32) {
    %c0_i32 = arith.constant 0 : i32
    %c0_i32_0 = arith.constant 0 : i32
    %c0_i32_1 = arith.constant 0 : i32
    return %c0_i32, %c0_i32_0 : i32, i32
  }
  func.func @transform_20(%arg0: i32) -> (i32, i32) {
    %c0_i32 = arith.constant 0 : i32
    %c0_i32_0 = arith.constant 0 : i32
    %c0_i32_1 = arith.constant 0 : i32
    return %c0_i32, %c0_i32_0 : i32, i32
  }
  func.func @transform_21(%arg0: i32) -> (i32, i32) {
    %c0_i32 = arith.constant 0 : i32
    %c0_i32_0 = arith.constant 0 : i32
    %c0_i32_1 = arith.constant 0 : i32
    return %c0_i32, %c0_i32_0 : i32, i32
  }
  func.func @transform_22(%arg0: i32) -> (i32, i32) {
    %c0_i32 = arith.constant 0 : i32
    %c0_i32_0 = arith.constant 0 : i32
    %c0_i32_1 = arith.constant 0 : i32
    return %c0_i32, %c0_i32_0 : i32, i32
  }
  func.func @transform_23(%arg0: i32) -> (i32, i32) {
    %c0_i32 = arith.constant 0 : i32
    %c0_i32_0 = arith.constant 0 : i32
    %c0_i32_1 = arith.constant 0 : i32
    return %c0_i32, %c0_i32_0 : i32, i32
  }
  func.func @transform_24(%arg0: i32) -> (i32, i32) {
    %c0_i32 = arith.constant 0 : i32
    %c0_i32_0 = arith.constant 0 : i32
    %c0_i32_1 = arith.constant 0 : i32
    return %c0_i32, %c0_i32_0 : i32, i32
  }
  func.func @transform_25(%arg0: i32) -> (i32, i32) {
    %c0_i32 = arith.constant 0 : i32
    %c0_i32_0 = arith.constant 0 : i32
    %c0_i32_1 = arith.constant 0 : i32
    return %c0_i32, %c0_i32_0 : i32, i32
  }
  func.func @transform_26(%arg0: i32) -> (i32, i32) {
    %c0_i32 = arith.constant 0 : i32
    %c0_i32_0 = arith.constant 0 : i32
    %c0_i32_1 = arith.constant 0 : i32
    return %c0_i32, %c0_i32_0 : i32, i32
  }
  func.func @transform_27(%arg0: i32) -> (i32, i32) {
    %c0_i32 = arith.constant 0 : i32
    %c0_i32_0 = arith.constant 0 : i32
    %c0_i32_1 = arith.constant 0 : i32
    return %c0_i32, %c0_i32_0 : i32, i32
  }
  func.func @transform_28(%arg0: i32) -> (i32, i32) {
    %c0_i32 = arith.constant 0 : i32
    %c0_i32_0 = arith.constant 0 : i32
    %c0_i32_1 = arith.constant 0 : i32
    return %c0_i32, %c0_i32_0 : i32, i32
  }
  func.func @transform_29(%arg0: i32) -> (i32, i32) {
    %c0_i32 = arith.constant 0 : i32
    %c0_i32_0 = arith.constant 0 : i32
    %c0_i32_1 = arith.constant 0 : i32
    return %c0_i32, %c0_i32_0 : i32, i32
  }
  func.func @transform_30(%arg0: i32) -> (i32, i32) {
    %c0_i32 = arith.constant 0 : i32
    %c0_i32_0 = arith.constant 0 : i32
    %c0_i32_1 = arith.constant 0 : i32
    return %c0_i32, %c0_i32_0 : i32, i32
  }
  func.func @transform_31(%arg0: i32) -> (i32, i32) {
    %c0_i32 = arith.constant 0 : i32
    %c0_i32_0 = arith.constant 0 : i32
    %c0_i32_1 = arith.constant 0 : i32
    return %c0_i32, %c0_i32_0 : i32, i32
  }
  func.func @transform_32(%arg0: i32) -> (i32, i32) {
    %c0_i32 = arith.constant 0 : i32
    %c0_i32_0 = arith.constant 0 : i32
    %c0_i32_1 = arith.constant 0 : i32
    return %c0_i32, %c0_i32_0 : i32, i32
  }
  func.func @transform_33(%arg0: i32) -> (i32, i32) {
    %c0_i32 = arith.constant 0 : i32
    %c0_i32_0 = arith.constant 0 : i32
    %c0_i32_1 = arith.constant 0 : i32
    return %c0_i32, %c0_i32_0 : i32, i32
  }
  func.func @transform_34(%arg0: i32) -> (i32, i32) {
    %c0_i32 = arith.constant 0 : i32
    %c0_i32_0 = arith.constant 0 : i32
    %c0_i32_1 = arith.constant 0 : i32
    return %c0_i32, %c0_i32_0 : i32, i32
  }
  func.func @transform_35(%arg0: i32) -> (i32, i32) {
    %c0_i32 = arith.constant 0 : i32
    %c0_i32_0 = arith.constant 0 : i32
    %c0_i32_1 = arith.constant 0 : i32
    return %c0_i32, %c0_i32_0 : i32, i32
  }
  func.func @transform_36(%arg0: i32) -> (i32, i32) {
    %c0_i32 = arith.constant 0 : i32
    %c0_i32_0 = arith.constant 0 : i32
    %c0_i32_1 = arith.constant 0 : i32
    return %c0_i32, %c0_i32_0 : i32, i32
  }
  func.func @transform_37(%arg0: i32) -> (i32, i32) {
    %c0_i32 = arith.constant 0 : i32
    %c0_i32_0 = arith.constant 0 : i32
    %c0_i32_1 = arith.constant 0 : i32
    return %c0_i32, %c0_i32_0 : i32, i32
  }
  func.func @transform_38(%arg0: i32) -> (i32, i32) {
    %c0_i32 = arith.constant 0 : i32
    %c0_i32_0 = arith.constant 0 : i32
    %c0_i32_1 = arith.constant 0 : i32
    return %c0_i32, %c0_i32_0 : i32, i32
  }
  func.func @transform_39(%arg0: i32) -> (i32, i32) {
    %c0_i32 = arith.constant 0 : i32
    %c0_i32_0 = arith.constant 0 : i32
    %c0_i32_1 = arith.constant 0 : i32
    return %c0_i32, %c0_i32_0 : i32, i32
  }
  func.func @transform_40(%arg0: i32) -> (i32, i32) {
    %c0_i32 = arith.constant 0 : i32
    %c0_i32_0 = arith.constant 0 : i32
    %c0_i32_1 = arith.constant 0 : i32
    return %c0_i32, %c0_i32_0 : i32, i32
  }
  func.func @transform_41(%arg0: i32) -> (i32, i32) {
    %c0_i32 = arith.constant 0 : i32
    %c0_i32_0 = arith.constant 0 : i32
    %c0_i32_1 = arith.constant 0 : i32
    return %c0_i32, %c0_i32_0 : i32, i32
  }
  func.func @transform_42(%arg0: i32) -> (i32, i32) {
    %c0_i32 = arith.constant 0 : i32
    %c0_i32_0 = arith.constant 0 : i32
    %c0_i32_1 = arith.constant 0 : i32
    return %c0_i32, %c0_i32_0 : i32, i32
  }
  func.func @transform_43(%arg0: i32) -> (i32, i32) {
    %c0_i32 = arith.constant 0 : i32
    %c0_i32_0 = arith.constant 0 : i32
    %c0_i32_1 = arith.constant 0 : i32
    return %c0_i32, %c0_i32_0 : i32, i32
  }
  func.func @transform_44(%arg0: i32) -> (i32, i32) {
    %c0_i32 = arith.constant 0 : i32
    %c0_i32_0 = arith.constant 0 : i32
    %c0_i32_1 = arith.constant 0 : i32
    return %c0_i32, %c0_i32_0 : i32, i32
  }
  func.func @transform_45(%arg0: i32) -> (i32, i32) {
    %c0_i32 = arith.constant 0 : i32
    %c0_i32_0 = arith.constant 0 : i32
    %c0_i32_1 = arith.constant 0 : i32
    return %c0_i32, %c0_i32_0 : i32, i32
  }
  func.func @transform_46(%arg0: i32) -> (i32, i32) {
    %c0_i32 = arith.constant 0 : i32
    %c0_i32_0 = arith.constant 0 : i32
    %c0_i32_1 = arith.constant 0 : i32
    return %c0_i32, %c0_i32_0 : i32, i32
  }
  func.func @transform_47(%arg0: i32) -> (i32, i32, i32) {
    %c0_i32 = arith.constant 0 : i32
    %c0_i32_0 = arith.constant 0 : i32
    %c0_i32_1 = arith.constant 0 : i32
    return %arg0, %c0_i32, %c0_i32_0 : i32, i32, i32
  }
}

</mosaic_0001>

<bundles_post_ra>
// kernel: tpu_custom_call.1
= control target key start
LH: loop header
LB: loop body
LE: loop exit
PB: predicated region body
PF: predicated region fallthrough
CT: control target
= control target key end

     0   :  { %s4876_s6 = smov 1   ;;  %s4877_s10 = smov 2   ;;  %s5796_s0 = inlined_call_operand.smem [shape: u32[48], index: -1, kind: input, shape index: {}] }
   0x1   :  { %s4963_s5 = sld [smem:[%s5796_s0]]   ;;  %s4878_s14 = smov 3  }
   0x2   :  { %s4968_s9 = sld [smem:[%s5796_s0 + %s4876_s6]]   ;;  %s4879_s18 = smov 4  }
   0x3   :  { %s4973_s13 = sld [smem:[%s5796_s0 + %s4877_s10]]   ;;  %s4880_s22 = smov 5  }
   0x4   :  { %s4978_s17 = sld [smem:[%s5796_s0 + %s4878_s14]]   ;;  %s4881_s26 = smov 6  }
   0x5   :  { %s4983_s21 = sld [smem:[%s5796_s0 + %s4879_s18]]   ;;  %s4882_s30 = smov 7  }
   0x6   :  { %s4988_s25 = sld [smem:[%s5796_s0 + %s4880_s22]]   ;;  %s4883_s4 = smov 8  }
   0x7   :  { %5839 = sst [smem:[#allocation64_spill]] %s4963_s5  ;;  %s4884_s10 = smov 9  }
   0x8   :  { %5840 = sst [smem:[#allocation65_spill]] %s4968_s9  ;;  %s4885_s15 = smov 10  }
   0x9   :  { %5841 = sst [smem:[#allocation66_spill]] %s4973_s13  ;;  %s4886_s20 = smov 11  }
   0xa   :  { %5842 = sst [smem:[#allocation67_spill]] %s4978_s17  ;;  %s4888_s1 = smov 13  }
   0xb   :  { %s4993_s29 = sld [smem:[%s5796_s0 + %s4881_s26]]   ;;  %s4887_s26 = smov 12  }
   0xc   :  { %5843 = sst [smem:[#allocation68_spill]] %s4988_s25  ;;  %s4889_s7 = smov 14  }
   0xd   :  { %s4998_s3 = sld [smem:[%s5796_s0 + %s4882_s30]]   ;;  %s4891_s22 = smov 16  }
   0xe   :  { %s5003_s8 = sld [smem:[%s5796_s0 + %s4883_s4]]   ;;  %s4892_s28 = smov 17  }
   0xf   :  { %s5008_s14 = sld [smem:[%s5796_s0 + %s4884_s10]]  }
  0x10   :  { %s5013_s19 = sld [smem:[%s5796_s0 + %s4885_s15]]   ;;  %s4890_s15 = smov 15  }
  0x11   :  { %s5018_s24 = sld [smem:[%s5796_s0 + %s4886_s20]]  }
  0x12   :  { %s5023_s30 = sld [smem:[%s5796_s0 + %s4887_s26]]  }
  0x13   :  { %5844 = sst [smem:[#allocation69_spill]] %s4998_s3 }
  0x14   :  { %5845 = sst [smem:[#allocation70_spill]] %s5003_s8 }
  0x15   :  { %s5028_s6 = sld [smem:[%s5796_s0 + %s4888_s1]]  }
  0x16   :  { %5846 = sst [smem:[#allocation71_spill]] %s5013_s19 }
  0x17   :  { %5847 = sst [smem:[#allocation72_spill]] %s5018_s24 }
  0x18   :  { %5848 = sst [smem:[#allocation73_spill]] %s5023_s30 }
  0x19   :  { %s5033_s12 = sld [smem:[%s5796_s0 + %s4889_s7]]   ;;  %s4893_s7 = smov 18  }
  0x1a   :  { %s5038_s20 = sld [smem:[%s5796_s0 + %s4890_s15]]   ;;  %s4894_s15 = smov 19  }
  0x1b   :  { %5849 = sst [smem:[#allocation74_spill]] %s5028_s6 }
  0x1c   :  { %s5043_s27 = sld [smem:[%s5796_s0 + %s4891_s22]]   ;;  %s4895_s22 = smov 20  }
  0x1d   :  { %s5048_s4 = sld [smem:[%s5796_s0 + %s4892_s28]]   ;;  %s4896_s28 = smov 21  }
  0x1e   :  { %s5053_s13 = sld [smem:[%s5796_s0 + %s4893_s7]]   ;;  %s4897_s7 = smov 22  }
  0x1f   :  { %5850 = sst [smem:[#allocation75_spill]] %s5033_s12 }
  0x20   :  { %5851 = sst [smem:[#allocation76_spill]] %s5038_s20 }
  0x21   :  { %s5058_s30 = sld [smem:[%s5796_s0 + %s4894_s15]]   ;;  %s4898_s15 = smov 23  }
  0x22   :  { %s5063_s6 = sld [smem:[%s5796_s0 + %s4895_s22]]   ;;  %s4899_s22 = smov 24  }
  0x23   :  { %5852 = sst [smem:[#allocation77_spill]] %s5048_s4 }
  0x24   :  { %5853 = sst [smem:[#allocation78_spill]] %s5053_s13 }
  0x25   :  { %s5068_s19 = sld [smem:[%s5796_s0 + %s4896_s28]]   ;;  %s4900_s28 = smov 25  }
  0x26   :  { %s5073_s8 = sld [smem:[%s5796_s0 + %s4897_s7]]   ;;  %s4901_s7 = smov 26  }
  0x27   :  { %5854 = sst [smem:[#allocation79_spill]] %s5058_s30 }
  0x28   :  { %5855 = sst [smem:[#allocation80_spill]] %s5063_s6 }
  0x29   :  { %s5078_s9 = sld [smem:[%s5796_s0 + %s4898_s15]]   ;;  %s4902_s15 = smov 27  }
  0x2a   :  { %s5083_s5 = sld [smem:[%s5796_s0 + %s4899_s22]]   ;;  %s4903_s22 = smov 28  }
  0x2b   :  { %5856 = sst [smem:[#allocation81_spill]] %s5068_s19 }
  0x2c   :  { %5857 = sst [smem:[#allocation82_spill]] %s5073_s8 }
  0x2d   :  { %s5088_s19 = sld [smem:[%s5796_s0 + %s4900_s28]]   ;;  %s4904_s28 = smov 29  }
  0x2e   :  { %s5093_s30 = sld [smem:[%s5796_s0 + %s4901_s7]]   ;;  %s4905_s7 = smov 30  }
  0x2f   :  { %5858 = sst [smem:[#allocation83_spill]] %s5078_s9 }
  0x30   :  { %5859 = sst [smem:[#allocation84_spill]] %s5083_s5 }
  0x31   :  { %s5098_s9 = sld [smem:[%s5796_s0 + %s4902_s15]]   ;;  %s4906_s15 = smov 31  }
  0x32   :  { %s5103_s4 = sld [smem:[%s5796_s0 + %s4903_s22]]   ;;  %s4907_s22 = smov 32  }
  0x33   :  { %5860 = sst [smem:[#allocation85_spill]] %s5088_s19 }
  0x34   :  { %5861 = sst [smem:[#allocation86_spill]] %s5093_s30 }
  0x35   :  { %s5108_s19 = sld [smem:[%s5796_s0 + %s4904_s28]]   ;;  %s4908_s28 = smov 33  }
  0x36   :  { %s5113_s30 = sld [smem:[%s5796_s0 + %s4905_s7]]   ;;  %s4909_s7 = smov 34  }
  0x37   :  { %5862 = sst [smem:[#allocation87_spill]] %s5098_s9 }
  0x38   :  { %5863 = sst [smem:[#allocation88_spill]] %s5103_s4 }
  0x39   :  { %s5118_s20 = sld [smem:[%s5796_s0 + %s4906_s15]]   ;;  %s4910_s15 = smov 35  }
  0x3a   :  { %s5123_s4 = sld [smem:[%s5796_s0 + %s4907_s22]]   ;;  %s4911_s22 = smov 36  }
  0x3b   :  { %s5128_s24 = sld [smem:[%s5796_s0 + %s4908_s28]]   ;;  %s4912_s28 = smov 37  }
  0x3c   :  { %5864 = sst [smem:[#allocation89_spill]] %s5113_s30 }
  0x3d   :  { %s5133_s30 = sld [smem:[%s5796_s0 + %s4909_s7]]   ;;  %s4913_s7 = smov 38  }
  0x3e   :  { %s5138_s3 = sld [smem:[%s5796_s0 + %s4910_s15]]   ;;  %s4914_s15 = smov 39  }
  0x3f   :  { %s5153_s25 = sld [smem:[%s5796_s0 + %s4913_s7]]   ;;  %s4917_s7 = smov 42  }
  0x40   :  { %5865 = sst [smem:[#allocation90_spill]] %s5123_s4 }
  0x41   :  { %5866 = sst [smem:[#allocation91_spill]] %s5128_s24 }
  0x42   :  { %s5143_s4 = sld [smem:[%s5796_s0 + %s4911_s22]]   ;;  %s4915_s22 = smov 40  }
  0x43   :  { %s5148_s24 = sld [smem:[%s5796_s0 + %s4912_s28]]   ;;  %s4916_s28 = smov 41  }
  0x44   :  { %5867 = sst [smem:[#allocation92_spill]] %s5138_s3 }
  0x45   :  { %s5158_s3 = sld [smem:[%s5796_s0 + %s4914_s15]]   ;;  %s4918_s15 = smov 43  }
  0x46   :  { %s5173_s17 = sld [smem:[%s5796_s0 + %s4917_s7]]   ;;  %s4921_s7 = smov 46  }
  0x48   :  { %5868 = sst [smem:[#allocation93_spill]] %s5143_s4 }
  0x49   :  { %5869 = sst [smem:[#allocation94_spill]] %s5148_s24 }
  0x4a   :  { %s5163_s4 = sld [smem:[%s5796_s0 + %s4915_s22]]   ;;  %s4919_s22 = smov 44  }
  0x4b   :  { %5870 = sst [smem:[#allocation95_spill]] %s5158_s3 }
  0x4c   :  { %s5168_s24 = sld [smem:[%s5796_s0 + %s4916_s28]]   ;;  %s4920_s28 = smov 45  }
  0x4d   :  { %5873 = sst [smem:[#allocation98_spill]] %s5173_s17 }
  0x4e   :  { %s5178_s3 = sld [smem:[%s5796_s0 + %s4918_s15]]   ;;  %s4922_s15 = smov 47  }
  0x4f   :  { %s5193_s17 = sld [smem:[%s5796_s0 + %s4921_s7]]  }
  0x50   :  { %5871 = sst [smem:[#allocation96_spill]] %s5163_s4 }
  0x51   :  { %s5183_s4 = sld [smem:[%s5796_s0 + %s4919_s22]]  }
  0x52   :  { %5872 = sst [smem:[#allocation97_spill]] %s5168_s24 }
  0x53   :  { %s5188_s24 = sld [smem:[%s5796_s0 + %s4920_s28]]  }
  0x54   :  { %5874 = sst [smem:[#allocation99_spill]] %s5178_s3 }
  0x55   :  { %s5198_s3 = sld [smem:[%s5796_s0 + %s4922_s15]]  }
  0x56   :  { %100 = vsyncpa [#allocation3], 0 }
  0x57   :  { %101 = vsyncpa [#allocation5], 0 }
  0x58   :  { %102 = vsyncpa [#allocation8], 0 }
  0x59   :  { %103 = vsyncpa [#allocation11], 0 }
  0x5a   :  { %104 = vsyncpa [#allocation14], 0 }
  0x5b   :  { %105 = vsyncpa [#allocation17], 0 }
  0x5c   :  { %106 = vsyncpa [#allocation20], 0 }
  0x5d   :  { %107 = vsyncpa [#allocation23], 0 }
  0x5e   :  { %108 = vsyncpa [#allocation26], 0 }
  0x5f   :  { %109 = vsyncpa [#allocation29], 0 }
  0x60   :  { %110 = vsyncpa [#allocation32], 0 }
  0x61   :  { %111 = vsyncpa [#allocation35], 0 }
  0x62   :  { %112 = vsyncpa [#allocation38], 0 }
  0x63   :  { %113 = vsyncpa [#allocation41], 0 }
  0x64   :  { %114 = vsyncpa [#allocation44], 0 }
  0x65   :  { %115 = vsyncpa [#allocation47], 0  ;;  %s5200_s22 = smov 0  }
  0x66 LB: > { %s5875_s13 = sld [smem:[#allocation78_spill]]  ;;  %s5206_s0 = sadd.s32 4294967295, %s4874_s22   ;;  %s4874_s22 = sphi %s5200_s22, %s121_s22  }
  0x67   : > { %s5876_s12 = sld [smem:[#allocation75_spill]]  ;;  %p3527_p0 = scmp.ge.s32.totalorder %s4874_s22, 1 }
  0x68   : > { %s5877_s9 = sld [smem:[#allocation87_spill]]  ;;  %p1154_p1 = scmp.lt.s32.totalorder %s4874_s22, 3 }
  0x69   : > { %s5878_s8 = sld [smem:[#allocation82_spill]] }
  0x6a   : > { %s5879_s5 = sld [smem:[#allocation84_spill]]  ;;  %p5210_p2 = pnand %p3527_p0, %p1154_p1 }
  0x6b   : > { %s5880_s6 = sld [smem:[#allocation80_spill]]  ;;  %p3781_p3 = scmp.eq.s32.totalorder (!%p5210_p2), %s5206_s0, 0 }
  0x6c   : > { %1158 = sbr.rel (%p5210_p2) target bundleno = 500 (0x1f4), region = 12  ;;  %s1178_s26 = sshll.u32 (!%p5210_p2), %s4983_s21, 4  ;;  %s1179_s26 = int_to_ptr.hbm [resolvable:$true] %s1178_s26 }
  0x6d   : > { %s4923_s28 = smov (!%p5210_p2), [#allocation4]   ;;  %s1202_s2 = sshll.u32 (!%p5210_p2), %s4993_s29, 4  ;;  %s5219_s2 = int_to_ptr.hbm [resolvable:$true] %s1202_s2 }
  0x6e   : > { %s1180_s1 = sshll.u32 (!%p5210_p2), %s4923_s28, 4  ;;  %s3964_s7 = sshra.s32 (!%p5210_p2), %s1179_s26, 4  ;;  %s1181_s1 = int_to_ptr.vmem [resolvable:$true] %s1180_s1  ;;  %s3965_s7 = int_to_ptr.hbm [resolvable:$true] %s3964_s7 }
  0x6f   : > { %s3966_s10 = scalar_lea.hbm (!%p5210_p2), %s3965_s7, 1  ;;  %s3970_s11 = scalar_lea.hbm (!%p5210_p2), %s4983_s21, 1 }
  0x70   : > { %p3967_p4 = scmp.ne.s32.totalorder (!%p5210_p2), %s3965_s7, %s3966_s10  ;;  %p3971_p7 = scmp.lt.s32.totalorder (!%p5210_p2), %s3965_s7, %s4983_s21 }
  0x71   : > { %p3972_p8 = scmp.lt.s32.totalorder %s3970_s11, %s3966_s10 }
  0x72   : > { %p3968_p5 = pnand %p3967_p4, %p3781_p3 }
  0x73   : > { %p3973_p9 = por %p3972_p8, %p3971_p7 }
  0x74   : > { %p3969_p6 = pneg %p3968_p5 }
  0x76   : > { %p3974_p10 = pnand %p3973_p9, %p3969_p6 }
  0x78   : > { %3977 = shalt.err (!%p3974_p10)
}
  0x79   : > { %3664 = dma.hbm_to_vmem [thread:$0]  (%p3781_p3), %s1179_s26, 16, %s1181_s1, [#allocation5]  }
  0x7a   : > { %s1229_s15 = sshll.u32 %s5008_s14, 4  ;;  %s4924_s16 = smov [#allocation7]   ;;  %s5228_s15 = int_to_ptr.hbm [resolvable:$true] %s1229_s15 }
  0x7b   : > { %s1204_s18 = sshll.u32 %s4924_s16, 4  ;;  %s3992_s28 = sshra.s32 %s5219_s2, 4  ;;  %s1205_s18 = int_to_ptr.vmem [resolvable:$true] %s1204_s18  ;;  %s3993_s28 = int_to_ptr.hbm [resolvable:$true] %s3992_s28 }
  0x7c   : > { %s3994_s7 = scalar_lea.hbm %s3993_s28, 4  ;;  %s3998_s10 = scalar_lea.hbm %s4993_s29, 4 }
  0x7d   : > { %p3995_p11 = scmp.ne.s32.totalorder %s3993_s28, %s3994_s7  ;;  %p3999_p0 = scmp.lt.s32.totalorder %s3993_s28, %s4993_s29 }
  0x7e   : > { %p4000_p1 = scmp.lt.s32.totalorder %s3998_s10, %s3994_s7 }
  0x7f   : > { %p3996_p12 = pnand %p3995_p11, %p3781_p3 }
  0x80   : > { %p4001_p4 = por %p4000_p1, %p3999_p0 }
  0x81   : > { %p3997_p13 = pneg %p3996_p12 }
  0x83   : > { %p4002_p5 = pnand %p4001_p4, %p3997_p13 }
  0x85   : > { %4005 = shalt.err (!%p4002_p5)
}
  0x86   : > { %3668 = dma.hbm_to_vmem [thread:$0]  (%p3781_p3), %s5219_s2, 64, %s1205_s18, [#allocation8]  }
  0x87   : > { %s4925_s26 = smov [#allocation10]   ;;  %s1262_s11 = sshll.u32 %s5876_s12, 4  ;;  %s5239_s11 = int_to_ptr.hbm [resolvable:$true] %s1262_s11 }
  0x88   : > { %s1231_s1 = sshll.u32 %s4925_s26, 4  ;;  %s4020_s16 = sshra.s32 %s5228_s15, 4  ;;  %s1232_s1 = int_to_ptr.vmem [resolvable:$true] %s1231_s1  ;;  %s4021_s16 = int_to_ptr.hbm [resolvable:$true] %s4020_s16 }
  0x89   : > { %s4022_s28 = scalar_lea.hbm %s4021_s16, 1  ;;  %s4026_s7 = scalar_lea.hbm %s5008_s14, 1 }
  0x8a   : > { %p4023_p6 = scmp.ne.s32.totalorder %s4021_s16, %s4022_s28  ;;  %p4027_p9 = scmp.lt.s32.totalorder %s4021_s16, %s5008_s14 }
  0x8b   : > { %p4028_p10 = scmp.lt.s32.totalorder %s4026_s7, %s4022_s28 }
  0x8c   : > { %p4024_p7 = pnand %p4023_p6, %p3781_p3 }
  0x8d   : > { %p4029_p11 = por %p4028_p10, %p4027_p9 }
  0x8e   : > { %p4025_p8 = pneg %p4024_p7 }
  0x90   : > { %p4030_p12 = pnand %p4029_p11, %p4025_p8 }
  0x92   : > { %4033 = shalt.err (!%p4030_p12)
}
  0x93   : > { %3672 = dma.hbm_to_vmem [thread:$0]  (%p3781_p3), %s5228_s15, 16, %s1232_s1, [#allocation11]  }
  0x94   : > { %s1288_s2 = sshll.u32 %s5043_s27, 4  ;;  %s4926_s18 = smov [#allocation13]   ;;  %s5250_s2 = int_to_ptr.hbm [resolvable:$true] %s1288_s2 }
  0x95   : > { %s1264_s10 = sshll.u32 %s4926_s18, 4  ;;  %s4048_s26 = sshra.s32 %s5239_s11, 4  ;;  %s1265_s10 = int_to_ptr.vmem [resolvable:$true] %s1264_s10  ;;  %s4049_s26 = int_to_ptr.hbm [resolvable:$true] %s4048_s26 }
  0x96   : > { %s4050_s16 = scalar_lea.hbm %s4049_s26, 1  ;;  %s4054_s28 = scalar_lea.hbm %s5876_s12, 1 }
  0x97   : > { %p4051_p13 = scmp.ne.s32.totalorder %s4049_s26, %s4050_s16  ;;  %p4055_p4 = scmp.lt.s32.totalorder %s4049_s26, %s5876_s12 }
  0x98   : > { %p4056_p5 = scmp.lt.s32.totalorder %s4054_s28, %s4050_s16 }
  0x99   : > { %p4052_p0 = pnand %p4051_p13, %p3781_p3 }
  0x9a   : > { %p4057_p6 = por %p4056_p5, %p4055_p4 }
  0x9b   : > { %p4053_p1 = pneg %p4052_p0 }
  0x9d   : > { %p4058_p7 = pnand %p4057_p6, %p4053_p1 }
  0x9f   : > { %4061 = shalt.err (!%p4058_p7)
}
  0xa0   : > { %3676 = dma.hbm_to_vmem [thread:$0]  (%p3781_p3), %s5239_s11, 16, %s1265_s10, [#allocation14]  }
  0xa1   : > { %s4927_s15 = smov [#allocation16]   ;;  %s1314_s7 = sshll.u32 %s5875_s13, 4  ;;  %s5261_s7 = int_to_ptr.hbm [resolvable:$true] %s1314_s7 }
  0xa2   : > { %s1290_s1 = sshll.u32 %s4927_s15, 4  ;;  %s4076_s18 = sshra.s32 %s5250_s2, 4  ;;  %s1291_s1 = int_to_ptr.vmem [resolvable:$true] %s1290_s1  ;;  %s4077_s18 = int_to_ptr.hbm [resolvable:$true] %s4076_s18 }
  0xa3   : > { %s4078_s26 = scalar_lea.hbm %s4077_s18, 1  ;;  %s4082_s16 = scalar_lea.hbm %s5043_s27, 1 }
  0xa4   : > { %p4079_p8 = scmp.ne.s32.totalorder %s4077_s18, %s4078_s26  ;;  %p4083_p11 = scmp.lt.s32.totalorder %s4077_s18, %s5043_s27 }
  0xa5   : > { %p4084_p12 = scmp.lt.s32.totalorder %s4082_s16, %s4078_s26 }
  0xa6   : > { %p4080_p9 = pnand %p4079_p8, %p3781_p3 }
  0xa7   : > { %p4085_p13 = por %p4084_p12, %p4083_p11 }
  0xa8   : > { %p4081_p10 = pneg %p4080_p9 }
  0xaa   : > { %p4086_p0 = pnand %p4085_p13, %p4081_p10 }
  0xac   : > { %4089 = shalt.err (!%p4086_p0)
}
  0xad   : > { %3680 = dma.hbm_to_vmem [thread:$0]  (%p3781_p3), %s5250_s2, 16, %s1291_s1, [#allocation17]  }
  0xae   : > { %s4928_s11 = smov [#allocation19]   ;;  %s1339_s28 = sshll.u32 %s5880_s6, 4  ;;  %s1340_s28 = int_to_ptr.hbm [resolvable:$true] %s1339_s28 }
  0xaf   : > { %s1316_s10 = sshll.u32 %s4928_s11, 4  ;;  %s4104_s15 = sshra.s32 %s5261_s7, 4  ;;  %s1317_s10 = int_to_ptr.vmem [resolvable:$true] %s1316_s10  ;;  %s4105_s15 = int_to_ptr.hbm [resolvable:$true] %s4104_s15 }
  0xb0   : > { %s4106_s18 = scalar_lea.hbm %s4105_s15, 1  ;;  %s4110_s26 = scalar_lea.hbm %s5875_s13, 1 }
  0xb1   : > { %p4107_p1 = scmp.ne.s32.totalorder %s4105_s15, %s4106_s18  ;;  %p4111_p6 = scmp.lt.s32.totalorder %s4105_s15, %s5875_s13 }
  0xb2   : > { %p4112_p7 = scmp.lt.s32.totalorder %s4110_s26, %s4106_s18 }
  0xb3   : > { %p4108_p4 = pnand %p4107_p1, %p3781_p3 }
  0xb4   : > { %p4113_p8 = por %p4112_p7, %p4111_p6 }
  0xb5   : > { %p4109_p5 = pneg %p4108_p4 }
  0xb7   : > { %p4114_p9 = pnand %p4113_p8, %p4109_p5 }
  0xb9   : > { %4117 = shalt.err (!%p4114_p9)
}
  0xba   : > { %3684 = dma.hbm_to_vmem [thread:$0]  (%p3781_p3), %s5261_s7, 16, %s1317_s10, [#allocation20]  }
  0xbb   : > { %s4929_s2 = smov [#allocation22]   ;;  %s1365_s16 = sshll.u32 %s5878_s8, 4  ;;  %s5281_s16 = int_to_ptr.hbm [resolvable:$true] %s1365_s16 }
  0xbc   : > { %s1341_s1 = sshll.u32 %s4929_s2, 4  ;;  %s4132_s11 = sshra.s32 %s1340_s28, 4  ;;  %s1342_s1 = int_to_ptr.vmem [resolvable:$true] %s1341_s1  ;;  %s4133_s11 = int_to_ptr.hbm [resolvable:$true] %s4132_s11 }
  0xbd   : > { %s4134_s15 = scalar_lea.hbm %s4133_s11, 32  ;;  %s4138_s18 = scalar_lea.hbm %s5880_s6, 32 }
  0xbe   : > { %p4135_p10 = scmp.ne.s32.totalorder %s4133_s11, %s4134_s15  ;;  %p4139_p13 = scmp.lt.s32.totalorder %s4133_s11, %s5880_s6 }
  0xbf   : > { %p4140_p0 = scmp.lt.s32.totalorder %s4138_s18, %s4134_s15 }
  0xc0   : > { %p4136_p11 = pnand %p4135_p10, %p3781_p3 }
  0xc1   : > { %p4141_p1 = por %p4140_p0, %p4139_p13 }
  0xc2   : > { %p4137_p12 = pneg %p4136_p11 }
  0xc4   : > { %p4142_p4 = pnand %p4141_p1, %p4137_p12 }
  0xc6   : > { %4145 = shalt.err (!%p4142_p4)
}
  0xc7   : > { %s5821_s7 = smov 128   ;;  %s5823_s10 = smov 8  }
  0xc8   : > { %3688 = dma.hbm_to_vmem [thread:$0]  (%p3781_p3), %s1340_s28, 512, %s1342_s1, [#allocation23], %s5821_s7, %s5821_s7, %s5823_s10  }
  0xc9   : > { %s1391_s26 = sshll.u32 %s5879_s5, 4  ;;  %s4932_s2 = smov [#allocation25]   ;;  %s5293_s26 = int_to_ptr.hbm [resolvable:$true] %s1391_s26 }
  0xca   : > { %s1367_s11 = sshll.u32 %s4932_s2, 4  ;;  %s4160_s15 = sshra.s32 %s5281_s16, 4  ;;  %s1368_s11 = int_to_ptr.vmem [resolvable:$true] %s1367_s11  ;;  %s4161_s15 = int_to_ptr.hbm [resolvable:$true] %s4160_s15 }
  0xcb   : > { %s4162_s18 = scalar_lea.hbm %s4161_s15, 32  ;;  %s4166_s6 = scalar_lea.hbm %s5878_s8, 32 }
  0xcc   : > { %p4163_p5 = scmp.ne.s32.totalorder %s4161_s15, %s4162_s18  ;;  %p4167_p8 = scmp.lt.s32.totalorder %s4161_s15, %s5878_s8 }
  0xcd   : > { %p4168_p9 = scmp.lt.s32.totalorder %s4166_s6, %s4162_s18 }
  0xce   : > { %p4164_p6 = pnand %p4163_p5, %p3781_p3 }
  0xcf   : > { %p4169_p10 = por %p4168_p9, %p4167_p8 }
  0xd0   : > { %p4165_p7 = pneg %p4164_p6 }
  0xd2   : > { %p4170_p11 = pnand %p4169_p10, %p4165_p7 }
  0xd4   : > { %4173 = shalt.err (!%p4170_p11)
}
  0xd5   : > { %3692 = dma.hbm_to_vmem [thread:$0]  (%p3781_p3), %s5281_s16, 512, %s1368_s11, [#allocation26], %s5821_s7, %s5821_s7, %s5823_s10  }
  0xd6   : > { %s4933_s28 = smov [#allocation28]   ;;  %s1420_s2 = sshll.u32 %s5877_s9, 4  ;;  %s5307_s2 = int_to_ptr.hbm [resolvable:$true] %s1420_s2 }
  0xd7   : > { %s1393_s1 = sshll.u32 %s4933_s28, 4  ;;  %s4188_s6 = sshra.s32 %s5293_s26, 4  ;;  %s1394_s1 = int_to_ptr.vmem [resolvable:$true] %s1393_s1  ;;  %s4189_s6 = int_to_ptr.hbm [resolvable:$true] %s4188_s6 }
  0xd8   : > { %s4190_s15 = scalar_lea.hbm %s4189_s6, 32  ;;  %s4194_s18 = scalar_lea.hbm %s5879_s5, 32 }
  0xd9   : > { %p4191_p12 = scmp.ne.s32.totalorder %s4189_s6, %s4190_s15  ;;  %p4195_p1 = scmp.lt.s32.totalorder %s4189_s6, %s5879_s5 }
  0xda   : > { %p4196_p4 = scmp.lt.s32.totalorder %s4194_s18, %s4190_s15 }
  0xdb   : > { %p4192_p13 = pnand %p4191_p12, %p3781_p3 }
  0xdc   : > { %p4197_p5 = por %p4196_p4, %p4195_p1 }
  0xdd   : > { %p4193_p0 = pneg %p4192_p13 }
  0xdf   : > { %p4198_p6 = pnand %p4197_p5, %p4193_p0 }
  0xe1   : > { %4201 = shalt.err (!%p4198_p6)
}
  0xe2   : > { %3696 = dma.hbm_to_vmem [thread:$0]  (%p3781_p3), %s5293_s26, 512, %s1394_s1, [#allocation29], %s5821_s7, %s5821_s7, %s5823_s10  }
  0xe3   : > { %s1446_s16 = sshll.u32 %s5108_s19, 4  ;;  %s4934_s11 = smov [#allocation31]   ;;  %s5321_s16 = int_to_ptr.hbm [resolvable:$true] %s1446_s16 }
  0xe4   : > { %s1422_s28 = sshll.u32 %s4934_s11, 4  ;;  %s4216_s6 = sshra.s32 %s5307_s2, 4  ;;  %s1423_s28 = int_to_ptr.vmem [resolvable:$true] %s1422_s28  ;;  %s4217_s6 = int_to_ptr.hbm [resolvable:$true] %s4216_s6 }
  0xe5   : > { %s4218_s15 = scalar_lea.hbm %s4217_s6, 32  ;;  %s4222_s18 = scalar_lea.hbm %s5877_s9, 32 }
  0xe6   : > { %p4219_p7 = scmp.ne.s32.totalorder %s4217_s6, %s4218_s15  ;;  %p4223_p10 = scmp.lt.s32.totalorder %s4217_s6, %s5877_s9 }
  0xe7   : > { %p4224_p11 = scmp.lt.s32.totalorder %s4222_s18, %s4218_s15 }
  0xe8   : > { %p4220_p8 = pnand %p4219_p7, %p3781_p3 }
  0xe9   : > { %p4225_p12 = por %p4224_p11, %p4223_p10 }
  0xea   : > { %p4221_p9 = pneg %p4220_p8 }
  0xec   : > { %p4226_p13 = pnand %p4225_p12, %p4221_p9 }
  0xee   : > { %4229 = shalt.err (!%p4226_p13)
}
  0xef   : > { %3700 = dma.hbm_to_vmem [thread:$0]  (%p3781_p3), %s5307_s2, 512, %s1423_s28, [#allocation32], %s5821_s7, %s5821_s7, %s5823_s10  }
  0xf0   : > { %s4935_s26 = smov [#allocation34]   ;;  %s1472_s11 = sshll.u32 %s5118_s20, 4  ;;  %s5335_s11 = int_to_ptr.hbm [resolvable:$true] %s1472_s11 }
  0xf1   : > { %s1448_s1 = sshll.u32 %s4935_s26, 4  ;;  %s4244_s6 = sshra.s32 %s5321_s16, 4  ;;  %s1449_s1 = int_to_ptr.vmem [resolvable:$true] %s1448_s1  ;;  %s4245_s6 = int_to_ptr.hbm [resolvable:$true] %s4244_s6 }
  0xf2   : > { %s4246_s15 = scalar_lea.hbm %s4245_s6, 32  ;;  %s4250_s18 = scalar_lea.hbm %s5108_s19, 32 }
  0xf3   : > { %p4247_p0 = scmp.ne.s32.totalorder %s4245_s6, %s4246_s15  ;;  %p4251_p5 = scmp.lt.s32.totalorder %s4245_s6, %s5108_s19 }
  0xf4   : > { %p4252_p6 = scmp.lt.s32.totalorder %s4250_s18, %s4246_s15 }
  0xf5   : > { %p4248_p1 = pnand %p4247_p0, %p3781_p3 }
  0xf6   : > { %p4253_p7 = por %p4252_p6, %p4251_p5 }
  0xf7   : > { %p4249_p4 = pneg %p4248_p1 }
  0xf9   : > { %p4254_p8 = pnand %p4253_p7, %p4249_p4 }
  0xfb   : > { %4257 = shalt.err (!%p4254_p8)
}
  0xfc   : > { %3704 = dma.hbm_to_vmem [thread:$0]  (%p3781_p3), %s5321_s16, 512, %s1449_s1, [#allocation35], %s5821_s7, %s5821_s7, %s5823_s10  }
  0xfd   : > { %s1503_s2 = sshll.u32 %s5133_s30, 4  ;;  %s4936_s28 = smov [#allocation37]   ;;  %s5349_s2 = int_to_ptr.hbm [resolvable:$true] %s1503_s2 }
  0xfe   : > { %s1474_s26 = sshll.u32 %s4936_s28, 4  ;;  %s4272_s6 = sshra.s32 %s5335_s11, 4  ;;  %s1475_s26 = int_to_ptr.vmem [resolvable:$true] %s1474_s26  ;;  %s4273_s6 = int_to_ptr.hbm [resolvable:$true] %s4272_s6 }
  0xff   : > { %s4274_s15 = scalar_lea.hbm %s4273_s6, 32  ;;  %s4278_s18 = scalar_lea.hbm %s5118_s20, 32 }
 0x100   : > { %p4275_p9 = scmp.ne.s32.totalorder %s4273_s6, %s4274_s15  ;;  %p4279_p12 = scmp.lt.s32.totalorder %s4273_s6, %s5118_s20 }
 0x101   : > { %p4280_p13 = scmp.lt.s32.totalorder %s4278_s18, %s4274_s15 }
 0x102   : > { %p4276_p10 = pnand %p4275_p9, %p3781_p3 }
 0x103   : > { %p4281_p0 = por %p4280_p13, %p4279_p12 }
 0x104   : > { %p4277_p11 = pneg %p4276_p10 }
 0x106   : > { %p4282_p1 = pnand %p4281_p0, %p4277_p11 }
 0x108   : > { %4285 = shalt.err (!%p4282_p1)
}
 0x109   : > { %3708 = dma.hbm_to_vmem [thread:$0]  (%p3781_p3), %s5335_s11, 512, %s1475_s26, [#allocation38], %s5821_s7, %s5821_s7, %s5823_s10  }
 0x10a   : > { %s4937_s16 = smov [#allocation40]   ;;  %s1537_s28 = sshll.u32 %s5153_s25, 4  ;;  %s5363_s28 = int_to_ptr.hbm [resolvable:$true] %s1537_s28 }
 0x10b   : > { %s1505_s1 = sshll.u32 %s4937_s16, 4  ;;  %s4300_s6 = sshra.s32 %s5349_s2, 4  ;;  %s1506_s1 = int_to_ptr.vmem [resolvable:$true] %s1505_s1  ;;  %s4301_s6 = int_to_ptr.hbm [resolvable:$true] %s4300_s6 }
 0x10c   : > { %s4302_s15 = scalar_lea.hbm %s4301_s6, 32  ;;  %s4306_s18 = scalar_lea.hbm %s5133_s30, 32 }
 0x10d   : > { %p4303_p4 = scmp.ne.s32.totalorder %s4301_s6, %s4302_s15  ;;  %p4307_p7 = scmp.lt.s32.totalorder %s4301_s6, %s5133_s30 }
 0x10e   : > { %p4308_p8 = scmp.lt.s32.totalorder %s4306_s18, %s4302_s15 }
 0x10f   : > { %p4304_p5 = pnand %p4303_p4, %p3781_p3 }
 0x110   : > { %p4309_p9 = por %p4308_p8, %p4307_p7 }
 0x111   : > { %p4305_p6 = pneg %p4304_p5 }
 0x113   : > { %p4310_p10 = pnand %p4309_p9, %p4305_p6 }
 0x115   : > { %4313 = shalt.err (!%p4310_p10)
}
 0x116   : > { %s5882_s11 = sld [smem:[#allocation67_spill]]  ;;  %s4938_s26 = smov [#allocation43]  }
 0x117   : > { %3712 = dma.hbm_to_vmem [thread:$0]  (%p3781_p3), %s5349_s2, 512, %s1506_s1, [#allocation41], %s5821_s7, %s5821_s7, %s5823_s10  }
 0x118   : > { %s1539_s16 = sshll.u32 %s4938_s26, 4  ;;  %s4328_s6 = sshra.s32 %s5363_s28, 4  ;;  %s1540_s16 = int_to_ptr.vmem [resolvable:$true] %s1539_s16  ;;  %s4329_s6 = int_to_ptr.hbm [resolvable:$true] %s4328_s6 }
 0x119   : > { %s4330_s15 = scalar_lea.hbm %s4329_s6, 32  ;;  %s4334_s18 = scalar_lea.hbm %s5153_s25, 32 }
 0x11a   : > { %p4331_p11 = scmp.ne.s32.totalorder %s4329_s6, %s4330_s15  ;;  %p4335_p0 = scmp.lt.s32.totalorder %s4329_s6, %s5153_s25 }
 0x11b   : > { %p4336_p1 = scmp.lt.s32.totalorder %s4334_s18, %s4330_s15 }
 0x11c   : > { %s1166_s5 = sshll.u32 %s5882_s11, 4  ;;  %p4332_p12 = pnand %p4331_p11, %p3781_p3  ;;  %s5377_s5 = int_to_ptr.hbm [resolvable:$true] %s1166_s5 }
 0x11d   : > { %p4337_p4 = por %p4336_p1, %p4335_p0 }
 0x11e   : > { %p4333_p13 = pneg %p4332_p12 }
 0x120   : > { %p4338_p5 = pnand %p4337_p4, %p4333_p13 }
 0x122   : > { %4341 = shalt.err (!%p4338_p5)
}
 0x123   : > { %s5883_s2 = sld [smem:[#allocation68_spill]]  ;;  %s4939_s26 = smov [#allocation2]  }
 0x124   : > { %3716 = dma.hbm_to_vmem [thread:$0]  (%p3781_p3), %s5363_s28, 512, %s1540_s16, [#allocation44], %s5821_s7, %s5821_s7, %s5823_s10  }
 0x125   : > { %s1168_s8 = sshll.u32 %s4939_s26, 4  ;;  %s4356_s6 = sshra.s32 %s5377_s5, 4  ;;  %s1169_s8 = int_to_ptr.vmem [resolvable:$true] %s1168_s8  ;;  %s4357_s6 = int_to_ptr.hbm [resolvable:$true] %s4356_s6 }
 0x126   : > { %s4358_s15 = scalar_lea.hbm %s4357_s6, 4  ;;  %s4362_s18 = scalar_lea.hbm %s5882_s11, 4 }
 0x127   : > { %p4359_p6 = scmp.ne.s32.totalorder %s4357_s6, %s4358_s15  ;;  %p4363_p9 = scmp.lt.s32.totalorder %s4357_s6, %s5882_s11 }
 0x128   : > { %p4364_p10 = scmp.lt.s32.totalorder %s4362_s18, %s4358_s15 }
 0x129   : > { %s1190_s1 = sshll.u32 %s5883_s2, 4  ;;  %p4360_p7 = pnand %p4359_p6, %p3781_p3  ;;  %s5391_s1 = int_to_ptr.hbm [resolvable:$true] %s1190_s1 }
 0x12a   : > { %p4365_p11 = por %p4364_p10, %p4363_p9 }
 0x12b   : > { %p4361_p8 = pneg %p4360_p7 }
 0x12d   : > { %p4366_p12 = pnand %p4365_p11, %p4361_p8 }
 0x12f   : > { %4369 = shalt.err (!%p4366_p12)
}
 0x130   : > { %s5884_s28 = sld [smem:[#allocation69_spill]]  ;;  %s4940_s16 = smov [#allocation6]  }
 0x131   : > { %3662 = dma.hbm_to_vmem [thread:$0]  (%p3781_p3), %s5377_s5, 64, %s1169_s8, [#allocation3]  }
 0x132   : > { %s1192_s26 = sshll.u32 %s4940_s16, 4  ;;  %s4384_s6 = sshra.s32 %s5391_s1, 4  ;;  %s1193_s26 = int_to_ptr.vmem [resolvable:$true] %s1192_s26  ;;  %s4385_s6 = int_to_ptr.hbm [resolvable:$true] %s4384_s6 }
 0x133   : > { %s4386_s15 = scalar_lea.hbm %s4385_s6, 4  ;;  %s4390_s18 = scalar_lea.hbm %s5883_s2, 4 }
 0x134   : > { %p4387_p13 = scmp.ne.s32.totalorder %s4385_s6, %s4386_s15  ;;  %p4391_p4 = scmp.lt.s32.totalorder %s4385_s6, %s5883_s2 }
 0x135   : > { %p4392_p5 = scmp.lt.s32.totalorder %s4390_s18, %s4386_s15 }
 0x136   : > { %s1214_s7 = sshll.u32 %s5884_s28, 4  ;;  %p4388_p0 = pnand %p4387_p13, %p3781_p3  ;;  %s5402_s7 = int_to_ptr.hbm [resolvable:$true] %s1214_s7 }
 0x137   : > { %p4393_p6 = por %p4392_p5, %p4391_p4 }
 0x138   : > { %p4389_p1 = pneg %p4388_p0 }
 0x13a   : > { %p4394_p7 = pnand %p4393_p6, %p4389_p1 }
 0x13c   : > { %4397 = shalt.err (!%p4394_p7)
}
 0x13d   : > { %s5885_s5 = sld [smem:[#allocation72_spill]]  ;;  %s4941_s16 = smov [#allocation9]  }
 0x13e   : > { %3666 = dma.hbm_to_vmem [thread:$0]  (%p3781_p3), %s5391_s1, 64, %s1193_s26, [#allocation5]  }
 0x13f   : > { %s1216_s10 = sshll.u32 %s4941_s16, 4  ;;  %s4412_s6 = sshra.s32 %s5402_s7, 4  ;;  %s1217_s10 = int_to_ptr.vmem [resolvable:$true] %s1216_s10  ;;  %s4413_s6 = int_to_ptr.hbm [resolvable:$true] %s4412_s6 }
 0x140   : > { %s4414_s15 = scalar_lea.hbm %s4413_s6, 1  ;;  %s4418_s18 = scalar_lea.hbm %s5884_s28, 1 }
 0x141   : > { %p4415_p8 = scmp.ne.s32.totalorder %s4413_s6, %s4414_s15  ;;  %p4419_p11 = scmp.lt.s32.totalorder %s4413_s6, %s5884_s28 }
 0x142   : > { %p4420_p12 = scmp.lt.s32.totalorder %s4418_s18, %s4414_s15 }
 0x143   : > { %s1244_s8 = sshll.u32 %s5885_s5, 4  ;;  %p4416_p9 = pnand %p4415_p8, %p3781_p3  ;;  %s5413_s8 = int_to_ptr.hbm [resolvable:$true] %s1244_s8 }
 0x144   : > { %p4421_p13 = por %p4420_p12, %p4419_p11 }
 0x145   : > { %p4417_p10 = pneg %p4416_p9 }
 0x147   : > { %p4422_p0 = pnand %p4421_p13, %p4417_p10 }
 0x149   : > { %4425 = shalt.err (!%p4422_p0)
}
 0x14a   : > { %s5886_s1 = sld [smem:[#allocation76_spill]]  ;;  %s4942_s26 = smov [#allocation12]  }
 0x14b   : > { %3670 = dma.hbm_to_vmem [thread:$0]  (%p3781_p3), %s5402_s7, 16, %s1217_s10, [#allocation8]  }
 0x14c   : > { %s1246_s16 = sshll.u32 %s4942_s26, 4  ;;  %s4440_s6 = sshra.s32 %s5413_s8, 4  ;;  %s1247_s16 = int_to_ptr.vmem [resolvable:$true] %s1246_s16  ;;  %s4441_s6 = int_to_ptr.hbm [resolvable:$true] %s4440_s6 }
 0x14d   : > { %s4442_s15 = scalar_lea.hbm %s4441_s6, 1  ;;  %s4446_s18 = scalar_lea.hbm %s5885_s5, 1 }
 0x14e   : > { %p4443_p1 = scmp.ne.s32.totalorder %s4441_s6, %s4442_s15  ;;  %p4447_p6 = scmp.lt.s32.totalorder %s4441_s6, %s5885_s5 }
 0x14f   : > { %p4448_p7 = scmp.lt.s32.totalorder %s4446_s18, %s4442_s15 }
 0x150   : > { %s1273_s2 = sshll.u32 %s5886_s1, 4  ;;  %p4444_p4 = pnand %p4443_p1, %p3781_p3  ;;  %s5424_s2 = int_to_ptr.hbm [resolvable:$true] %s1273_s2 }
 0x151   : > { %p4449_p8 = por %p4448_p7, %p4447_p6 }
 0x152   : > { %p4445_p5 = pneg %p4444_p4 }
 0x154   : > { %p4450_p9 = pnand %p4449_p8, %p4445_p5 }
 0x156   : > { %4453 = shalt.err (!%p4450_p9)
}
 0x157   : > { %s5887_s7 = sld [smem:[#allocation77_spill]]  ;;  %s4943_s26 = smov [#allocation15]  }
 0x158   : > { %3674 = dma.hbm_to_vmem [thread:$0]  (%p3781_p3), %s5413_s8, 16, %s1247_s16, [#allocation11]  }
 0x159   : > { %s1275_s9 = sshll.u32 %s4943_s26, 4  ;;  %s4468_s6 = sshra.s32 %s5424_s2, 4  ;;  %s1276_s9 = int_to_ptr.vmem [resolvable:$true] %s1275_s9  ;;  %s4469_s6 = int_to_ptr.hbm [resolvable:$true] %s4468_s6 }
 0x15a   : > { %s4470_s15 = scalar_lea.hbm %s4469_s6, 32  ;;  %s4474_s18 = scalar_lea.hbm %s5886_s1, 32 }
 0x15b   : > { %p4471_p10 = scmp.ne.s32.totalorder %s4469_s6, %s4470_s15  ;;  %p4475_p13 = scmp.lt.s32.totalorder %s4469_s6, %s5886_s1 }
 0x15c   : > { %p4476_p0 = scmp.lt.s32.totalorder %s4474_s18, %s4470_s15 }
 0x15d   : > { %s1299_s10 = sshll.u32 %s5887_s7, 4  ;;  %p4472_p11 = pnand %p4471_p10, %p3781_p3  ;;  %s5435_s10 = int_to_ptr.hbm [resolvable:$true] %s1299_s10 }
 0x15e   : > { %p4477_p1 = por %p4476_p0, %p4475_p13 }
 0x15f   : > { %p4473_p12 = pneg %p4472_p11 }
 0x161   : > { %p4478_p4 = pnand %p4477_p1, %p4473_p12 }
 0x163   : > { %4481 = shalt.err (!%p4478_p4)
}
 0x164   : > { %s5888_s8 = smov 8   ;;  %s5889_s16 = smov 128  }
 0x165   : > { %s5890_s26 = sld [smem:[#allocation79_spill]]  ;;  %s4944_s5 = smov [#allocation18]  }
 0x166   : > { %3678 = dma.hbm_to_vmem [thread:$0]  (%p3781_p3), %s5424_s2, 512, %s1276_s9, [#allocation14], %s5889_s16, %s5889_s16, %s5888_s8  }
 0x167   : > { %s1301_s11 = sshll.u32 %s4944_s5, 4  ;;  %s4496_s6 = sshra.s32 %s5435_s10, 4  ;;  %s1302_s11 = int_to_ptr.vmem [resolvable:$true] %s1301_s11  ;;  %s4497_s6 = int_to_ptr.hbm [resolvable:$true] %s4496_s6 }
 0x168   : > { %s4498_s15 = scalar_lea.hbm %s4497_s6, 32  ;;  %s4502_s18 = scalar_lea.hbm %s5887_s7, 32 }
 0x169   : > { %p4499_p5 = scmp.ne.s32.totalorder %s4497_s6, %s4498_s15  ;;  %p4503_p8 = scmp.lt.s32.totalorder %s4497_s6, %s5887_s7 }
 0x16a   : > { %p4504_p9 = scmp.lt.s32.totalorder %s4502_s18, %s4498_s15 }
 0x16b   : > { %s1325_s12 = sshll.u32 %s5890_s26, 4  ;;  %p4500_p6 = pnand %p4499_p5, %p3781_p3  ;;  %s5449_s12 = int_to_ptr.hbm [resolvable:$true] %s1325_s12 }
 0x16c   : > { %p4505_p10 = por %p4504_p9, %p4503_p8 }
 0x16d   : > { %p4501_p7 = pneg %p4500_p6 }
 0x16f   : > { %p4506_p11 = pnand %p4505_p10, %p4501_p7 }
 0x171   : > { %4509 = shalt.err (!%p4506_p11)
}
 0x172   : > { %s5891_s9 = sld [smem:[#allocation81_spill]]  ;;  %s4945_s5 = smov [#allocation21]  }
 0x173   : > { %3682 = dma.hbm_to_vmem [thread:$0]  (%p3781_p3), %s5435_s10, 512, %s1302_s11, [#allocation17], %s5889_s16, %s5889_s16, %s5888_s8  }
 0x174   : > { %s1327_s1 = sshll.u32 %s4945_s5, 4  ;;  %s4524_s6 = sshra.s32 %s5449_s12, 4  ;;  %s1328_s1 = int_to_ptr.vmem [resolvable:$true] %s1327_s1  ;;  %s4525_s6 = int_to_ptr.hbm [resolvable:$true] %s4524_s6 }
 0x175   : > { %s4526_s15 = scalar_lea.hbm %s4525_s6, 32  ;;  %s4530_s18 = scalar_lea.hbm %s5890_s26, 32 }
 0x176   : > { %p4527_p12 = scmp.ne.s32.totalorder %s4525_s6, %s4526_s15  ;;  %p4531_p1 = scmp.lt.s32.totalorder %s4525_s6, %s5890_s26 }
 0x177   : > { %p4532_p4 = scmp.lt.s32.totalorder %s4530_s18, %s4526_s15 }
 0x178   : > { %s1354_s2 = sshll.u32 %s5891_s9, 4  ;;  %p4528_p13 = pnand %p4527_p12, %p3781_p3  ;;  %s5463_s2 = int_to_ptr.hbm [resolvable:$true] %s1354_s2 }
 0x179   : > { %p4533_p5 = por %p4532_p4, %p4531_p1 }
 0x17a   : > { %p4529_p0 = pneg %p4528_p13 }
 0x17c   : > { %p4534_p6 = pnand %p4533_p5, %p4529_p0 }
 0x17e   : > { %4537 = shalt.err (!%p4534_p6)
}
 0x17f   : > { %s5892_s11 = sld [smem:[#allocation83_spill]]  ;;  %s4946_s10 = smov [#allocation24]  }
 0x180   : > { %3686 = dma.hbm_to_vmem [thread:$0]  (%p3781_p3), %s5449_s12, 512, %s1328_s1, [#allocation20], %s5889_s16, %s5889_s16, %s5888_s8  }
 0x181   : > { %s1356_s5 = sshll.u32 %s4946_s10, 4  ;;  %s4552_s6 = sshra.s32 %s5463_s2, 4  ;;  %s1357_s5 = int_to_ptr.vmem [resolvable:$true] %s1356_s5  ;;  %s4553_s6 = int_to_ptr.hbm [resolvable:$true] %s4552_s6 }
 0x182   : > { %s4554_s15 = scalar_lea.hbm %s4553_s6, 1  ;;  %s4558_s18 = scalar_lea.hbm %s5891_s9, 1 }
 0x183   : > { %p4555_p7 = scmp.ne.s32.totalorder %s4553_s6, %s4554_s15  ;;  %p4559_p10 = scmp.lt.s32.totalorder %s4553_s6, %s5891_s9 }
 0x184   : > { %p4560_p11 = scmp.lt.s32.totalorder %s4558_s18, %s4554_s15 }
 0x185   : > { %s1380_s7 = sshll.u32 %s5892_s11, 4  ;;  %p4556_p8 = pnand %p4555_p7, %p3781_p3  ;;  %s5477_s7 = int_to_ptr.hbm [resolvable:$true] %s1380_s7 }
 0x186   : > { %p4561_p12 = por %p4560_p11, %p4559_p10 }
 0x187   : > { %p4557_p9 = pneg %p4556_p8 }
 0x189   : > { %p4562_p13 = pnand %p4561_p12, %p4557_p9 }
 0x18b   : > { %4565 = shalt.err (!%p4562_p13)
}
 0x18c   : > { %s5893_s12 = sld [smem:[#allocation85_spill]]  ;;  %s4947_s10 = smov [#allocation27]  }
 0x18d   : > { %3690 = dma.hbm_to_vmem [thread:$0]  (%p3781_p3), %s5463_s2, 16, %s1357_s5, [#allocation23]  }
 0x18e   : > { %s1382_s13 = sshll.u32 %s4947_s10, 4  ;;  %s4580_s6 = sshra.s32 %s5477_s7, 4  ;;  %s1383_s13 = int_to_ptr.vmem [resolvable:$true] %s1382_s13  ;;  %s4581_s6 = int_to_ptr.hbm [resolvable:$true] %s4580_s6 }
 0x18f   : > { %s4582_s15 = scalar_lea.hbm %s4581_s6, 1  ;;  %s4586_s18 = scalar_lea.hbm %s5892_s11, 1 }
 0x190   : > { %p4583_p0 = scmp.ne.s32.totalorder %s4581_s6, %s4582_s15  ;;  %p4587_p5 = scmp.lt.s32.totalorder %s4581_s6, %s5892_s11 }
 0x191   : > { %p4588_p6 = scmp.lt.s32.totalorder %s4586_s18, %s4582_s15 }
 0x192   : > { %s1406_s1 = sshll.u32 %s5893_s12, 4  ;;  %p4584_p1 = pnand %p4583_p0, %p3781_p3  ;;  %s5488_s1 = int_to_ptr.hbm [resolvable:$true] %s1406_s1 }
 0x193   : > { %p4589_p7 = por %p4588_p6, %p4587_p5 }
 0x194   : > { %p4585_p4 = pneg %p4584_p1 }
 0x196   : > { %p4590_p8 = pnand %p4589_p7, %p4585_p4 }
 0x198   : > { %4593 = shalt.err (!%p4590_p8)
}
 0x199   : > { %s5894_s2 = sld [smem:[#allocation88_spill]]  ;;  %s4948_s5 = smov [#allocation30]  }
 0x19a   : > { %3694 = dma.hbm_to_vmem [thread:$0]  (%p3781_p3), %s5477_s7, 16, %s1383_s13, [#allocation26]  }
 0x19b   : > { %s1408_s10 = sshll.u32 %s4948_s5, 4  ;;  %s4608_s6 = sshra.s32 %s5488_s1, 4  ;;  %s1409_s10 = int_to_ptr.vmem [resolvable:$true] %s1408_s10  ;;  %s4609_s6 = int_to_ptr.hbm [resolvable:$true] %s4608_s6 }
 0x19c   : > { %s4610_s15 = scalar_lea.hbm %s4609_s6, 1  ;;  %s4614_s18 = scalar_lea.hbm %s5893_s12, 1 }
 0x19d   : > { %p4611_p9 = scmp.ne.s32.totalorder %s4609_s6, %s4610_s15  ;;  %p4615_p12 = scmp.lt.s32.totalorder %s4609_s6, %s5893_s12 }
 0x19e   : > { %p4616_p13 = scmp.lt.s32.totalorder %s4614_s18, %s4610_s15 }
 0x19f   : > { %s1435_s9 = sshll.u32 %s5894_s2, 4  ;;  %p4612_p10 = pnand %p4611_p9, %p3781_p3  ;;  %s5499_s9 = int_to_ptr.hbm [resolvable:$true] %s1435_s9 }
 0x1a0   : > { %p4617_p0 = por %p4616_p13, %p4615_p12 }
 0x1a1   : > { %p4613_p11 = pneg %p4612_p10 }
 0x1a3   : > { %p4618_p1 = pnand %p4617_p0, %p4613_p11 }
 0x1a5   : > { %4621 = shalt.err (!%p4618_p1)
}
 0x1a6   : > { %s5895_s13 = sld [smem:[#allocation89_spill]]  ;;  %s4949_s5 = smov [#allocation33]  }
 0x1a7   : > { %3698 = dma.hbm_to_vmem [thread:$0]  (%p3781_p3), %s5488_s1, 16, %s1409_s10, [#allocation29]  }
 0x1a8   : > { %s1437_s11 = sshll.u32 %s4949_s5, 4  ;;  %s4636_s6 = sshra.s32 %s5499_s9, 4  ;;  %s1438_s11 = int_to_ptr.vmem [resolvable:$true] %s1437_s11  ;;  %s4637_s6 = int_to_ptr.hbm [resolvable:$true] %s4636_s6 }
 0x1a9   : > { %s4638_s15 = scalar_lea.hbm %s4637_s6, 1  ;;  %s4642_s18 = scalar_lea.hbm %s5894_s2, 1 }
 0x1aa   : > { %p4639_p4 = scmp.ne.s32.totalorder %s4637_s6, %s4638_s15  ;;  %p4643_p7 = scmp.lt.s32.totalorder %s4637_s6, %s5894_s2 }
 0x1ab   : > { %p4644_p8 = scmp.lt.s32.totalorder %s4642_s18, %s4638_s15 }
 0x1ac   : > { %s1461_s7 = sshll.u32 %s5895_s13, 4  ;;  %p4640_p5 = pnand %p4639_p4, %p3781_p3  ;;  %s5510_s7 = int_to_ptr.hbm [resolvable:$true] %s1461_s7 }
 0x1ad   : > { %p4645_p9 = por %p4644_p8, %p4643_p7 }
 0x1ae   : > { %p4641_p6 = pneg %p4640_p5 }
 0x1b0   : > { %p4646_p10 = pnand %p4645_p9, %p4641_p6 }
 0x1b2   : > { %4649 = shalt.err (!%p4646_p10)
}
 0x1b3   : > { %s5896_s1 = sld [smem:[#allocation91_spill]]  ;;  %s4950_s10 = smov [#allocation36]  }
 0x1b4   : > { %3702 = dma.hbm_to_vmem [thread:$0]  (%p3781_p3), %s5499_s9, 16, %s1438_s11, [#allocation32]  }
 0x1b5   : > { %s1463_s5 = sshll.u32 %s4950_s10, 4  ;;  %s4664_s6 = sshra.s32 %s5510_s7, 4  ;;  %s1464_s5 = int_to_ptr.vmem [resolvable:$true] %s1463_s5  ;;  %s4665_s6 = int_to_ptr.hbm [resolvable:$true] %s4664_s6 }
 0x1b6   : > { %s4666_s15 = scalar_lea.hbm %s4665_s6, 1  ;;  %s4670_s18 = scalar_lea.hbm %s5895_s13, 1 }
 0x1b7   : > { %p4667_p11 = scmp.ne.s32.totalorder %s4665_s6, %s4666_s15  ;;  %p4671_p0 = scmp.lt.s32.totalorder %s4665_s6, %s5895_s13 }
 0x1b8   : > { %p4672_p1 = scmp.lt.s32.totalorder %s4670_s18, %s4666_s15 }
 0x1b9   : > { %s1489_s12 = sshll.u32 %s5896_s1, 4  ;;  %p4668_p12 = pnand %p4667_p11, %p3781_p3  ;;  %s5521_s12 = int_to_ptr.hbm [resolvable:$true] %s1489_s12 }
 0x1ba   : > { %p4673_p4 = por %p4672_p1, %p4671_p0 }
 0x1bb   : > { %p4669_p13 = pneg %p4668_p12 }
 0x1bd   : > { %p4674_p5 = pnand %p4673_p4, %p4669_p13 }
 0x1bf   : > { %4677 = shalt.err (!%p4674_p5)
}
 0x1c0   : > { %s5897_s9 = sld [smem:[#allocation93_spill]]  ;;  %s4951_s10 = smov [#allocation39]  }
 0x1c1   : > { %3706 = dma.hbm_to_vmem [thread:$0]  (%p3781_p3), %s5510_s7, 16, %s1464_s5, [#allocation35]  }
 0x1c2   : > { %s1491_s2 = sshll.u32 %s4951_s10, 4  ;;  %s4692_s6 = sshra.s32 %s5521_s12, 4  ;;  %s1492_s2 = int_to_ptr.vmem [resolvable:$true] %s1491_s2  ;;  %s4693_s6 = int_to_ptr.hbm [resolvable:$true] %s4692_s6 }
 0x1c3   : > { %s4694_s15 = scalar_lea.hbm %s4693_s6, 32  ;;  %s4698_s18 = scalar_lea.hbm %s5896_s1, 32 }
 0x1c4   : > { %p4695_p6 = scmp.ne.s32.totalorder %s4693_s6, %s4694_s15  ;;  %p4699_p9 = scmp.lt.s32.totalorder %s4693_s6, %s5896_s1 }
 0x1c5   : > { %p4700_p10 = scmp.lt.s32.totalorder %s4698_s18, %s4694_s15 }
 0x1c6   : > { %s1520_s11 = sshll.u32 %s5897_s9, 4  ;;  %p4696_p7 = pnand %p4695_p6, %p3781_p3  ;;  %s5532_s11 = int_to_ptr.hbm [resolvable:$true] %s1520_s11 }
 0x1c7   : > { %p4701_p11 = por %p4700_p10, %p4699_p9 }
 0x1c8   : > { %p4697_p8 = pneg %p4696_p7 }
 0x1ca   : > { %p4702_p12 = pnand %p4701_p11, %p4697_p8 }
 0x1cc   : > { %4705 = shalt.err (!%p4702_p12)
}
 0x1cd   : > { %s5898_s7 = sld [smem:[#allocation96_spill]]  ;;  %s4952_s5 = smov [#allocation42]  }
 0x1ce   : > { %3710 = dma.hbm_to_vmem [thread:$0]  (%p3781_p3), %s5521_s12, 512, %s1492_s2, [#allocation38], %s5889_s16, %s5889_s16, %s5888_s8  }
 0x1cf   : > { %s1522_s10 = sshll.u32 %s4952_s5, 4  ;;  %s4720_s6 = sshra.s32 %s5532_s11, 4  ;;  %s1523_s10 = int_to_ptr.vmem [resolvable:$true] %s1522_s10  ;;  %s4721_s6 = int_to_ptr.hbm [resolvable:$true] %s4720_s6 }
 0x1d0   : > { %s4722_s15 = scalar_lea.hbm %s4721_s6, 32  ;;  %s4726_s18 = scalar_lea.hbm %s5897_s9, 32 }
 0x1d1   : > { %p4723_p13 = scmp.ne.s32.totalorder %s4721_s6, %s4722_s15  ;;  %p4727_p4 = scmp.lt.s32.totalorder %s4721_s6, %s5897_s9 }
 0x1d2   : > { %p4728_p5 = scmp.lt.s32.totalorder %s4726_s18, %s4722_s15 }
 0x1d3   : > { %s1554_s13 = sshll.u32 %s5898_s7, 4  ;;  %p4724_p0 = pnand %p4723_p13, %p3781_p3  ;;  %s5546_s13 = int_to_ptr.hbm [resolvable:$true] %s1554_s13 }
 0x1d4   : > { %p4729_p6 = por %p4728_p5, %p4727_p4 }
 0x1d5   : > { %p4725_p1 = pneg %p4724_p0 }
 0x1d7   : > { %p4730_p7 = pnand %p4729_p6, %p4725_p1 }
 0x1d9   : > { %4733 = shalt.err (!%p4730_p7)
}
 0x1da   : > { %s5899_s12 = sld [smem:[#allocation99_spill]]  ;;  %s4953_s5 = smov [#allocation45]  }
 0x1db   : > { %3714 = dma.hbm_to_vmem [thread:$0]  (%p3781_p3), %s5532_s11, 512, %s1523_s10, [#allocation41], %s5889_s16, %s5889_s16, %s5888_s8  }
 0x1dc   : > { %s1556_s1 = sshll.u32 %s4953_s5, 4  ;;  %s4748_s6 = sshra.s32 %s5546_s13, 4  ;;  %s1557_s1 = int_to_ptr.vmem [resolvable:$true] %s1556_s1  ;;  %s4749_s6 = int_to_ptr.hbm [resolvable:$true] %s4748_s6 }
 0x1dd   : > { %s4750_s15 = scalar_lea.hbm %s4749_s6, 32  ;;  %s4754_s18 = scalar_lea.hbm %s5898_s7, 32 }
 0x1de   : > { %p4751_p8 = scmp.ne.s32.totalorder %s4749_s6, %s4750_s15  ;;  %p4755_p11 = scmp.lt.s32.totalorder %s4749_s6, %s5898_s7 }
 0x1df   : > { %p4756_p12 = scmp.lt.s32.totalorder %s4754_s18, %s4750_s15 }
 0x1e0   : > { %s1574_s2 = sshll.u32 %s5899_s12, 4  ;;  %p4752_p9 = pnand %p4751_p8, %p3781_p3  ;;  %s5560_s2 = int_to_ptr.hbm [resolvable:$true] %s1574_s2 }
 0x1e1   : > { %p4757_p13 = por %p4756_p12, %p4755_p11 }
 0x1e2   : > { %p4753_p10 = pneg %p4752_p9 }
 0x1e4   : > { %p4758_p0 = pnand %p4757_p13, %p4753_p10 }
 0x1e6   : > { %4761 = shalt.err (!%p4758_p0)
}
 0x1e7   : > { %3718 = dma.hbm_to_vmem [thread:$0]  (%p3781_p3), %s5546_s13, 512, %s1557_s1, [#allocation44], %s5889_s16, %s5889_s16, %s5888_s8  }
 0x1e8   : > { %s4954_s11 = smov [#allocation46]   ;;  %s4776_s5 = sshra.s32 %s5560_s2, 4  ;;  %s4777_s5 = int_to_ptr.hbm [resolvable:$true] %s4776_s5 }
 0x1e9   : > { %s1576_s10 = sshll.u32 %s4954_s11, 4  ;;  %s4778_s6 = scalar_lea.hbm %s4777_s5, 32  ;;  %s1577_s10 = int_to_ptr.vmem [resolvable:$true] %s1576_s10 }
 0x1ea   : > { %p4779_p1 = scmp.ne.s32.totalorder %s4777_s5, %s4778_s6  ;;  %s4782_s15 = scalar_lea.hbm %s5899_s12, 32 }
 0x1eb   : > { %p4783_p6 = scmp.lt.s32.totalorder %s4777_s5, %s5899_s12  ;;  %p4784_p7 = scmp.lt.s32.totalorder %s4782_s15, %s4778_s6 }
 0x1ec   : > { %p4780_p4 = pnand %p4779_p1, %p3781_p3 }
 0x1ed   : > { %p4785_p8 = por %p4784_p7, %p4783_p6 }
 0x1ee   : > { %p4781_p5 = pneg %p4780_p4 }
 0x1f0   : > { %p4786_p9 = pnand %p4785_p8, %p4781_p5 }
 0x1f2   : > { %4789 = shalt.err (!%p4786_p9)
}
 0x1f3   : > { %3720 = dma.hbm_to_vmem [thread:$0]  (%p3781_p3), %s5560_s2, 512, %s1577_s10, [#allocation47], %s5889_s16, %s5889_s16, %s5888_s8  }
 0x1f4 PF: > { %1625 = sbr.rel (%p5210_p2) target bundleno = 3393 (0xd41), region = 208  ;;  %p3811_p10 = scmp.eq.s32.totalorder (!%p5210_p2), %s5206_s0, 0 }
 0x1f9   : > { %4809 = dma.done.wait (%p3811_p10), [#allocation3], 64  }
 0x1fa   : > { %4811 = vsyncadd (%p3811_p10), [#allocation3], 4294967232 }
 0x1fb   : > { %4813 = dma.done.wait (%p3811_p10), [#allocation5], 80  }
 0x1fc   : > { %4815 = vsyncadd (%p3811_p10), [#allocation5], 4294967216 }
 0x1fd   : > { %4817 = dma.done.wait (%p3811_p10), [#allocation8], 80  }
 0x1fe   : > { %4819 = vsyncadd (%p3811_p10), [#allocation8], 4294967216 }
 0x1ff   : > { %4821 = dma.done.wait (%p3811_p10), [#allocation11], 32  }
 0x200   : > { %4823 = vsyncadd (%p3811_p10), [#allocation11], 4294967264 }
 0x201   : > { %4825 = dma.done.wait (%p3811_p10), [#allocation14], 528  }
 0x202   : > { %4827 = vsyncadd (%p3811_p10), [#allocation14], 4294966768 }
 0x203   : > { %4829 = dma.done.wait (%p3811_p10), [#allocation17], 528  }
 0x204   : > { %4831 = vsyncadd (%p3811_p10), [#allocation17], 4294966768 }
 0x205   : > { %4833 = dma.done.wait (%p3811_p10), [#allocation20], 528  }
 0x206   : > { %4835 = vsyncadd (%p3811_p10), [#allocation20], 4294966768 }
 0x207   : > { %4837 = dma.done.wait (%p3811_p10), [#allocation23], 528  }
 0x208   : > { %4839 = vsyncadd (%p3811_p10), [#allocation23], 4294966768 }
 0x209   : > { %4841 = dma.done.wait (%p3811_p10), [#allocation26], 528  }
 0x20a   : > { %4843 = vsyncadd (%p3811_p10), [#allocation26], 4294966768 }
 0x20b   : > { %4845 = dma.done.wait (%p3811_p10), [#allocation29], 528  }
 0x20c   : > { %4847 = vsyncadd (%p3811_p10), [#allocation29], 4294966768 }
 0x20d   : > { %4849 = dma.done.wait (%p3811_p10), [#allocation32], 528  }
 0x20e   : > { %4851 = vsyncadd (%p3811_p10), [#allocation32], 4294966768 }
 0x20f   : > { %4853 = dma.done.wait (%p3811_p10), [#allocation35], 528  }
 0x210   : > { %4855 = vsyncadd (%p3811_p10), [#allocation35], 4294966768 }
 0x211   : > { %4857 = dma.done.wait (%p3811_p10), [#allocation38], 1024  }
 0x212   : > { %4859 = vsyncadd (%p3811_p10), [#allocation38], 4294966272 }
 0x213   : > { %4861 = dma.done.wait (%p3811_p10), [#allocation41], 1024  }
 0x214   : > { %4863 = vsyncadd (%p3811_p10), [#allocation41], 4294966272 }
 0x215   : > { %4865 = dma.done.wait (%p3811_p10), [#allocation44], 1024  }
 0x216   : > { %4867 = vsyncadd (%p3811_p10), [#allocation44], 4294966272 }
 0x217   : > { %4869 = dma.done.wait (%p3811_p10), [#allocation47], 512  }
 0x218   : > { %4871 = vsyncadd (%p3811_p10), [#allocation47], 4294966784  ;;  %s5900_s23 = sld [smem:[#allocation64_spill]]  ;;  %p1893_p2 = scmp.lt.s32.totalorder %s5206_s0, 1  ;;  %vm1936_vm0 = vcmask 1043456   ;;  %vm1923_vm1 = vcmask 31744  }
 0x219   : > { %v5657_v0 = vld [vmem:[#allocation2] sm:$0xf]  ;;  %s5901_s13 = sld [smem:[#allocation65_spill]]  ;;  %v1995_v4 = vld [vmem:[#allocation6] sm:$0xf]  ;;  %vm2004_vm2 = vcmask 1042432  }
 0x21a   : > { %s5915_s0 = smov (!%p1893_p2, %s5206_s0), 1  ;;  %3598 = vmatpush.msk.msra.mxu0 %vm1936_vm0, %v5657_v0  ;;  %3656 = vmatpush.msk.msra.mxu1 %vm1936_vm0, %v5657_v0  ;;  %v1996_v8 = vld [vmem:[#allocation7] sm:$0x7]  ;;  %vm1997_vm3 = vcmask 23552   ;;  %s5902_s1 = sld [smem:[#allocation70_spill]]  ;;  %vm1972_vm4 = vcmask 64512  }
 0x21b   : > { %s5653_s8 = sshll.u32 %s5915_s0, 4  ;;  %3604 = vmatpush.msk.msra.mxu2 %vm1936_vm0, %v1995_v4  ;;  %v5672_v16 = vld [vmem:[#allocation4] ss:$0 sm:$0xff]  ;;  %v3930_v27 = vld [vmem:[#allocation9] ss:$0 sm:$0xff]  ;;  %vm2073_vm5 = vcmask 261120  }
 0x21c   : > { %3601 = vmatpush.msk.msrb.mxu1 %vm2004_vm2, %v1996_v8  ;;  %s5903_s2 = sld [smem:[#allocation71_spill]]  ;;  %v3931_v52 = vld [vmem:[#allocation10] ss:$0 sm:$0xff]  ;;  %v3932_v4 = vld [vmem:[#allocation12] ss:$0 sm:$0xff]  ;;  %vm2174_vm6 = vcmask 130048  }
 0x21d   : > { %s5904_s18 = sld [smem:[#allocation74_spill]]  ;;  %vm3108_vm7 = vcmask 15360  }
 0x21e   : > { %s1897_s16 = scalar_lea.vmem %s5900_s23, %s5653_s8  ;;  %s5905_s11 = sld [smem:[#allocation73_spill]] }
 0x21f   : > { %v1915_v1 = vld [vmem:[%s1897_s16] sm:$0xff]  ;;  %v1916_v2 = vld [vmem:[%s1897_s16 + $0x8] sm:$0xff]  ;;  %s1902_s0 = scalar_lea.vmem %s5901_s13, %s5653_s8  ;;  %s5906_s10 = sld [smem:[#allocation86_spill]] }
 0x220   : > { %v1921_v3 = vmul.f32 %v1915_v1, %v1915_v1  ;;  %3599 = vmatmul.msk.f32.vlgmr.msra.gmra.mxu0 %vm1923_vm1, %v1915_v1  ;;  %3600 = vmatmul.msk.f32.vlgmr.msra.gmra.mxu1 %vm1923_vm1, %v1916_v2  ;;  %v1922_v6 = vmul.f32 %v1916_v2, %v1916_v2  ;;  %v1917_v9 = vld [vmem:[%s1902_s0] sm:$0xff]  ;;  %v1918_v10 = vld [vmem:[%s1902_s0 + $0x8] sm:$0xff]  ;;  %v2068_v25 = vld [vmem:[%s5902_s1 + $0x18] sm:$0xff]  ;;  %s5907_s5 = sld [smem:[#allocation66_spill]] }
 0x221   : > { %3605 = vmatmul.msk.f32.vlgmr.msra.gmra.mxu2 %vm1923_vm1, %v1915_v1  ;;  %v2067_v26 = vld [vmem:[%s5902_s1 + $0x10] sm:$0xff]  ;;  %3657 = vmatpush.msra.mxu3 %v2068_v25  ;;  %v2066_v32 = vld [vmem:[%s5902_s1 + $0x8] sm:$0xff]  ;;  %v2065_v33 = vld [vmem:[%s5902_s1] sm:$0xff]  ;;  %s5908_s6 = sld [smem:[#allocation90_spill]] }
 0x222   : > { %v1924_v5 = vsel %vm1923_vm1, %v1921_v3, 0.0  ;;  %v1927_v7 = vsel %vm1923_vm1, %v1922_v6, 0.0  ;;  %2092 = vmatpush.msrb.mxu2 %v2068_v25  ;;  %v2108_v49 = vld [vmem:[%s5903_s2 + $0x18] sm:$0xff]  ;;  %v2107_v50 = vld [vmem:[%s5903_s2 + $0x10] sm:$0xff]  ;;  %v2106_v51 = vld [vmem:[%s5903_s2 + $0x8] sm:$0xff]  ;;  %s5909_s23 = sld [smem:[#allocation92_spill]] }
 0x223   : > { %1925 = vadd.xlane.f32.xlu0 %v1924_v5  ;;  %3658 = vmatpush.msra.mxu3 %v2067_v26  ;;  %v2105_v53 = vld [vmem:[%s5903_s2] sm:$0xff]  ;;  %v2206_v8 = vld [vmem:[%s5904_s18 + $0x18] sm:$0xff]  ;;  %s5910_s16 = sld [smem:[#allocation94_spill]] }
 0x224   : > { %2093 = vmatpush.msrb.mxu2 %v2067_v26  ;;  %2131 = vmatpush.msrb.mxu0 %v2108_v49  ;;  %v2261_v25 = vld [vmem:[#allocation15 + $0x10] sm:$0xff]  ;;  %v2260_v26 = vld [vmem:[#allocation15 + $0x8] sm:$0xff]  ;;  %s5911_s13 = sld [smem:[#allocation95_spill]] }
 0x225   : > { %3659 = vmatpush.msra.mxu3 %v2066_v32  ;;  %s5912_s0 = sld [smem:[#allocation97_spill]] }
 0x226   : > { %2094 = vmatpush.msrb.mxu2 %v2066_v32  ;;  %2132 = vmatpush.msrb.mxu0 %v2107_v50  ;;  %v2420_v50 = vld [vmem:[#allocation22 + $0x18] sm:$0xff]  ;;  %s1907_s15 = scalar_lea.vmem %s5907_s5, %s5653_s8  ;;  %s5913_s5 = sld [smem:[#allocation98_spill]] }
 0x227   : > { %3660 = vmatpush.msra.mxu3 %v2065_v33 }
 0x228   : > { %3602 = vmatmul.msk.f32.vlgmr.msrb.gmra.mxu1 %vm1997_vm3, %v1917_v9  ;;  %2095 = vmatpush.msrb.mxu2 %v2065_v33  ;;  %v2202_v9 = vld [vmem:[%s5905_s11 + $0x18] sm:$0xff] }
 0x229   : > { %3606 = vmatmul.msk.f32.gmra.mxu2 %vm1923_vm1, %v1916_v2  ;;  %2133 = vmatpush.msrb.mxu0 %v2106_v51  ;;  %v2419_v51 = vld [vmem:[#allocation22 + $0x10] sm:$0xff] }
 0x22a   : > { %2222 = vmatpush.msra.mxu2 %v2206_v8  ;;  %2245 = vmatpush.msrb.mxu3 %v2202_v9 }
 0x22b   : > { %1928 = vadd.xlane.f32.xlu0 %v1927_v7  ;;  %2134 = vmatpush.msrb.mxu0 %v2105_v53  ;;  %v2417_v53 = vld [vmem:[#allocation22] sm:$0xff] }
 0x22d   : > { %2354 = vmatpush.msra.mxu0 %v2202_v9  ;;  %v2504_v9 = vld [vmem:[#allocation28 + $0x10] sm:$0xff] }
 0x230   : > { %3603 = vmatmul.msk.f32.gmra.mxu1 %vm1997_vm3, %v1918_v10  ;;  %v2205_v10 = vld [vmem:[%s5904_s18 + $0x10] sm:$0xff] }
 0x231   : > { %2223 = vmatpush.msra.mxu2 %v2205_v10 }
 0x296   : > { %v1926_v11 = vpop.xlane.xlu0 %1925 }
 0x29d   : > { %v1957_v12 = vpop.f32.mrf.mxu0  ;;  %v1960_v13 = vpop.f32.mrf.mxu1 }
 0x29e   : > { %v1963_v14 = vmul.f32 2.0, %v1957_v12  ;;  %v1964_v15 = vmul.f32 2.0, %v1960_v13  ;;  %v1929_v17 = vpop.xlane.xlu0 %1928  ;;  %v2204_v12 = vld [vmem:[%s5904_s18 + $0x8] sm:$0xff] }
 0x29f   : > { %v2200_v13 = vld [vmem:[%s5905_s11 + $0x8] sm:$0xff]  ;;  %2224 = vmatpush.msra.mxu2 %v2204_v12 }
 0x2a0   : > { %v1965_v18 = vsub.f32 %v1963_v14, %v1926_v11  ;;  %v1966_v20 = vsub.f32 %v1964_v15, %v1929_v17  ;;  %v2201_v11 = vld [vmem:[%s5905_s11 + $0x10] sm:$0xff]  ;;  %v2203_v15 = vld [vmem:[%s5904_s18] sm:$0xff] }
 0x2a1   : > { %2355 = vmatpush.msra.mxu0 %v2201_v11  ;;  %2246 = vmatpush.msrb.mxu3 %v2201_v11  ;;  %v2199_v17 = vld [vmem:[%s5905_s11] sm:$0xff] }
 0x2a2   : > { %v1970_v19 = vsub.f32 %v1965_v18, %v5672_v16  ;;  %v1971_v22 = vsub.f32 %v1966_v20, %v5672_v16  ;;  %2225 = vmatpush.msra.mxu2 %v2203_v15  ;;  %v2416_v18 = vld [vmem:[#allocation21 + $0x18] sm:$0xff]  ;;  %v2414_v20 = vld [vmem:[#allocation21 + $0x8] sm:$0xff] }
 0x2a3   : > { %2356 = vmatpush.msra.mxu0 %v2200_v13  ;;  %2247 = vmatpush.msrb.mxu3 %v2200_v13  ;;  %v2502_v11 = vld [vmem:[#allocation28] sm:$0xff]  ;;  %v3937_v13 = vld [vmem:[#allocation27] ss:$0 sm:$0xff] }
 0x2a4   : > { %v1973_v21 = vsel %vm1972_vm4, %v1970_v19, -inf  ;;  %v1976_v23 = vsel %vm1972_vm4, %v1971_v22, -inf  ;;  %v2051_v24 = vpop.f32.mrf.mxu2 }
 0x2a5   : > { %1974 = vmax.xlane.f32.xlu1 %v1973_v21  ;;  %v2025_v28 = vpop.f32.mrf.mxu1  ;;  %2357 = vmatpush.msra.mxu0 %v2199_v17  ;;  %v2413_v21 = vld [vmem:[#allocation21] sm:$0xff] }
 0x2a6   : > { %v2052_v29 = vadd.f32 %v2051_v24, %v2025_v28  ;;  %2248 = vmatpush.msrb.mxu3 %v2199_v17  ;;  %v2262_v24 = vld [vmem:[#allocation15 + $0x18] sm:$0xff] }
 0x2a7   : > { %v2294_v28 = vld [vmem:[#allocation18 + $0x18] sm:$0xff] }
 0x2a8   : > { %v2061_v30 = vadd.f32 %v3930_v27, %v2052_v29  ;;  %v3933_v29 = vld [vmem:[#allocation13] ss:$0 sm:$0xff] }
 0x2aa   : > { %v2063_v31 = vmax.f32 %v2061_v30, 0.0 }
 0x2ac   : > { %v2054_v34 = vpop.f32.mrf.mxu2  ;;  %3607 = vmatmul.msk.f32.vlgmr.msrb.gmra.mxu2 %vm2073_vm5, %v2063_v31 }
 0x2ad   : > { %1977 = vmax.xlane.f32.xlu1 %v1976_v23  ;;  %v2028_v35 = vpop.f32.mrf.mxu1  ;;  %2314 = vmatpush.msrb.mxu2 %v2294_v28 }
 0x2ae   : > { %v2055_v36 = vadd.f32 %v2054_v34, %v2028_v35 }
 0x2b0   : > { %v2062_v37 = vadd.f32 %v3930_v27, %v2055_v36  ;;  %v2259_v27 = vld [vmem:[#allocation15] sm:$0xff] }
 0x2b2   : > { %v2064_v38 = vmax.f32 %v2062_v37, 0.0 }
 0x2b4   : > { %3608 = vmatmul.msk.f32.vlgmr.msra.gmra.mxu3 %vm2073_vm5, %v2064_v38 }
 0x2b5   : > { %2334 = vmatpush.msra.mxu3 %v2206_v8 }
 0x2b7   : > { %2335 = vmatpush.msra.mxu3 %v2205_v10  ;;  %v2503_v10 = vld [vmem:[#allocation28 + $0x8] sm:$0xff] }
 0x2b9   : > { %2336 = vmatpush.msra.mxu3 %v2204_v12  ;;  %v2542_v12 = vld [vmem:[#allocation31 + $0x18] sm:$0xff] }
 0x2bb   : > { %2337 = vmatpush.msra.mxu3 %v2203_v15 }
 0x318   : > { %v1975_v39 = vpop.xlane.xlu1 %1974 }
 0x319   : > { %v1979_v40 = vsub.f32 %v1970_v19, %v1975_v39  ;;  %v2415_v19 = vld [vmem:[#allocation21 + $0x10] sm:$0xff] }
 0x31b   : > { %v1981_v41 = vmul.f32 1.442695, %v1979_v40  ;;  %v2293_v40 = vld [vmem:[#allocation18 + $0x10] sm:$0xff] }
 0x31c   : > { %2315 = vmatpush.msrb.mxu2 %v2293_v40 }
 0x31d   : > { %3948 = vpow2.f32 %v1981_v41  ;;  %v2292_v41 = vld [vmem:[#allocation18 + $0x8] sm:$0xff] }
 0x31e   : > { %2316 = vmatpush.msrb.mxu2 %v2292_v41 }
 0x320   : > { %v1978_v42 = vpop.xlane.xlu1 %1977 }
 0x321   : > { %v1980_v43 = vsub.f32 %v1971_v22, %v1978_v42  ;;  %v2291_v42 = vld [vmem:[#allocation18] sm:$0xff] }
 0x322   : > { %2317 = vmatpush.msrb.mxu2 %v2291_v42 }
 0x323   : > { %v3949_v44 = vpop.eup %3948  ;;  %v1983_v45 = vmul.f32 1.442695, %v1980_v43  ;;  %v3934_v43 = vld [vmem:[#allocation16] ss:$0 sm:$0xff] }
 0x324   : > { %v1985_v46 = vsel %vm1972_vm4, %v3949_v44, 0.0 }
 0x325   : > { %3950 = vpow2.f32 %v1983_v45  ;;  %1986 = vadd.xlane.f32.xlu2 %v1985_v46 }
 0x32b   : > { %v3951_v47 = vpop.eup %3950 }
 0x32c   : > { %v1988_v48 = vsel %vm1972_vm4, %v3951_v47, 0.0 }
 0x32d   : > { %1989 = vadd.xlane.f32.xlu2 %v1988_v48 }
 0x32f   : > { %v2097_v54 = vpop.f32.mrf.mxu2 }
 0x330   : > { %v2098_v55 = vadd.f32 %v3931_v52, %v2097_v54 }
 0x332   : > { %v2103_v56 = vmax.f32 %v2098_v55, 0.0  ;;  %v3935_v55 = vld [vmem:[#allocation19] ss:$0 sm:$0xff] }
 0x334   : > { %3609 = vmatmul.msk.f32.vlgmr.msrb.gmra.mxu0 %vm2073_vm5, %v2103_v56 }
 0x335   : > { %2456 = vmatpush.msrb.mxu0 %v2416_v18  ;;  %v2541_v18 = vld [vmem:[#allocation31 + $0x10] sm:$0xff] }
 0x337   : > { %v2100_v57 = vpop.f32.mrf.mxu3  ;;  %2457 = vmatpush.msrb.mxu0 %v2415_v19  ;;  %v2538_v19 = vld [vmem:[%s5906_s10 + $0x18] sm:$0xff] }
 0x338   : > { %v2101_v58 = vadd.f32 %v3931_v52, %v2100_v57  ;;  %v2418_v52 = vld [vmem:[#allocation22 + $0x8] sm:$0xff] }
 0x339   : > { %2458 = vmatpush.msrb.mxu0 %v2414_v20  ;;  %v2540_v20 = vld [vmem:[#allocation31 + $0x8] sm:$0xff] }
 0x33a   : > { %v2104_v59 = vmax.f32 %v2101_v58, 0.0 }
 0x33b   : > { %2459 = vmatpush.msrb.mxu0 %v2413_v21  ;;  %v2537_v21 = vld [vmem:[%s5906_s10 + $0x10] sm:$0xff] }
 0x33c   : > { %3610 = vmatmul.msk.f32.gmra.mxu0 %vm2073_vm5, %v2104_v59 }
 0x398   : > { %v1987_v60 = vpop.xlane.xlu2 %1986 }
 0x399   : > { %3952 = vrcp.f32 %v1987_v60 }
 0x39f   : > { %v3953_v61 = vpop.eup %3952 }
 0x3a0   : > { %v1990_v62 = vpop.xlane.xlu2 %1989  ;;  %v1993_v63 = vmul.f32 %v3953_v61, %v3949_v44  ;;  %v2473_v61 = vld [vmem:[#allocation25 + $0x18] sm:$0xff] }
 0x3a1   : > { %3954 = vrcp.f32 %v1990_v62  ;;  %v2472_v62 = vld [vmem:[#allocation25 + $0x10] sm:$0xff] }
 0x3a2   : > { %2142 = vxpose.xlu0.b32.start [1/2] (short) (narrow) %v1993_v63, 8  ;;  %v2471_v63 = vld [vmem:[#allocation25 + $0x8] sm:$0xff] }
 0x3a7   : > { %v3955_v1 = vpop.eup %3954 }
 0x3a8   : > { %v1994_v2 = vmul.f32 %v3955_v1, %v3951_v47  ;;  %v2470_v1 = vld [vmem:[#allocation25] sm:$0xff] }
 0x3aa   : > { %2143 = vxpose.xlu0.b32.end [2/2] (short) (narrow) %v1994_v2, 8  ;;  %v2505_v2 = vld [vmem:[#allocation28 + $0x18] sm:$0xff] }
 0x3b1   : > { %v2136_v3 = vpop.f32.mrf.mxu0 }
 0x3b2   : > { %v2137_v6 = vadd.f32 %v3932_v4, %v2136_v3  ;;  %v3936_v3 = vld [vmem:[#allocation24] ss:$0 sm:$0xff] }
 0x3b9   : > { %v2139_v5 = vpop.f32.mrf.mxu0 }
 0x3ba   : > { %v2140_v7 = vadd.f32 %v3932_v4, %v2139_v5 }
 0x3bc   : > { %2192 = vmatpush.msra.mxu1 %v2140_v7 }
 0x3be   : > { %2193 = vmatpush.msra.mxu1 %v2137_v6 }
 0x3c0   : > { %2282 = vmatpush.msrb.mxu1 %v2262_v24 }
 0x3c2   : > { %2283 = vmatpush.msrb.mxu1 %v2261_v25 }
 0x3c4   : > { %2284 = vmatpush.msrb.mxu1 %v2260_v26 }
 0x3c6   : > { %2285 = vmatpush.msrb.mxu1 %v2259_v27 }
 0x446   : > { %v2158_v14 = vpop.trf.xlu0 }
 0x447   : > { %3611 = vmatmul.msk.f32.vlgmr.msra.gmra.mxu1 %vm2174_vm6, %v2158_v14 }
 0x448   : > { %2379 = vmatpush.msra.mxu1 %v2262_v24  ;;  %v2536_v24 = vld [vmem:[%s5906_s10 + $0x8] sm:$0xff] }
 0x44a   : > { %2380 = vmatpush.msra.mxu1 %v2261_v25  ;;  %v2535_v25 = vld [vmem:[%s5906_s10] sm:$0xff] }
 0x44c   : > { %2381 = vmatpush.msra.mxu1 %v2260_v26  ;;  %v3938_v26 = vld [vmem:[#allocation30] ss:$0 sm:$0xff] }
 0x44e   : > { %2382 = vmatpush.msra.mxu1 %v2259_v27 }
 0x4c4   : > { %v5700_v22 = vpop.f32.mrf.mxu1 }
 0x4c5   : > { %3612 = vmatmul.msk.f32.vlgmr.msra.gmra.mxu2 %vm2073_vm5, %v5700_v22  ;;  %3617 = vmatmul.msk.f32.vlgmr.msra.gmra.mxu0 %vm2073_vm5, %v5700_v22  ;;  %v2198_v23 = vrot.slane %v5700_v22, 1 }
 0x4c6   : > { %2403 = vmatpush.msra.mxu2 %v2294_v28  ;;  %2581 = vmatpush.msra.mxu0 %v2538_v19 }
 0x4c7   : > { %3613 = vmatmul.msk.f32.vlgmr.msrb.gmra.mxu3 %vm2073_vm5, %v2198_v23 }
 0x4c8   : > { %2404 = vmatpush.msra.mxu2 %v2293_v40  ;;  %2436 = vmatpush.msrb.mxu3 %v2420_v50  ;;  %v3939_v40 = vld [vmem:[#allocation33] ss:$0 sm:$0xff]  ;;  %v2629_v50 = vld [vmem:[#allocation37 + $0x10] sm:$0xff] }
 0x4c9   : > { %2582 = vmatpush.msra.mxu0 %v2537_v21 }
 0x4ca   : > { %2405 = vmatpush.msra.mxu2 %v2292_v41  ;;  %2437 = vmatpush.msrb.mxu3 %v2419_v51  ;;  %v2628_v51 = vld [vmem:[#allocation37 + $0x8] sm:$0xff] }
 0x4cb   : > { %2583 = vmatpush.msra.mxu0 %v2536_v24 }
 0x4cc   : > { %2406 = vmatpush.msra.mxu2 %v2291_v42  ;;  %2438 = vmatpush.msrb.mxu3 %v2418_v52  ;;  %v2627_v52 = vld [vmem:[#allocation37] sm:$0xff] }
 0x4cd   : > { %3621 = vmatmul.msk.f32.vlgmr.msrb.gmra.mxu0 %vm2073_vm5, %v5700_v22 }
 0x4ce   : > { %2439 = vmatpush.msrb.mxu3 %v2417_v53  ;;  %2584 = vmatpush.msra.mxu0 %v2535_v25  ;;  %v3940_v53 = vld [vmem:[#allocation36] ss:$0 sm:$0xff] }
 0x4cf   : > { %3616 = vmatmul.msk.f32.vlgmr.msra.gmra.mxu3 %vm2073_vm5, %v2198_v23  ;;  %v2539_v23 = vld [vmem:[#allocation31] sm:$0xff] }
 0x4d0   : > { %2558 = vmatpush.msra.mxu3 %v2542_v12  ;;  %2690 = vmatpush.msrb.mxu0 %v2538_v19  ;;  %v3942_v19 = vld [vmem:[%s5909_s23] ss:$0 sm:$0xff] }
 0x4d2   : > { %2559 = vmatpush.msra.mxu3 %v2541_v18  ;;  %2691 = vmatpush.msrb.mxu0 %v2537_v21 }
 0x4d4   : > { %2560 = vmatpush.msra.mxu3 %v2540_v20  ;;  %2692 = vmatpush.msrb.mxu0 %v2536_v24 }
 0x4d6   : > { %2561 = vmatpush.msra.mxu3 %v2539_v23  ;;  %2693 = vmatpush.msrb.mxu0 %v2535_v25 }
 0x542   : > { %v2359_v35 = vpop.f32.mrf.mxu0 }
 0x548   : > { %v2227_v30 = vpop.f32.mrf.mxu2 }
 0x54a   : > { %v2250_v31 = vpop.f32.mrf.mxu3  ;;  %v2461_v4 = vpop.f32.mrf.mxu0 }
 0x54b   : > { %v2251_v32 = vadd.f32 %v2250_v31, %v2227_v30  ;;  %v2752_v31 = vld [vmem:[#allocation39 + $0x18] sm:$0xff] }
 0x54d   : > { %v2257_v33 = vadd.f32 %v3933_v29, %v2251_v32  ;;  %v2751_v32 = vld [vmem:[#allocation39 + $0x10] sm:$0xff] }
 0x54f   : > { %v2258_v34 = vmax.f32 %v2257_v33, 0.0  ;;  %v2750_v33 = vld [vmem:[#allocation39 + $0x8] sm:$0xff] }
 0x551   : > { %3614 = vmatmul.msk.f32.vlgmr.msrb.gmra.mxu1 %vm2073_vm5, %v2258_v34  ;;  %v2749_v34 = vld [vmem:[#allocation39] sm:$0xff] }
 0x552   : > { %v2339_v36 = vpop.f32.mrf.mxu3  ;;  %2493 = vmatpush.msrb.mxu1 %v2473_v61  ;;  %v2755_v61 = vld [vmem:[#allocation40 + $0x10] sm:$0xff] }
 0x553   : > { %v2360_v37 = vadd.f32 %v2359_v35, %v2339_v36  ;;  %v2597_v35 = vld [vmem:[#allocation34 + $0x10] sm:$0xff]  ;;  %v2596_v36 = vld [vmem:[#allocation34 + $0x8] sm:$0xff] }
 0x554   : > { %2494 = vmatpush.msrb.mxu1 %v2472_v62  ;;  %v2754_v62 = vld [vmem:[#allocation40 + $0x8] sm:$0xff] }
 0x555   : > { %v2362_v38 = vadd.f32 %v3933_v29, %v2360_v37  ;;  %v2595_v37 = vld [vmem:[#allocation34] sm:$0xff] }
 0x556   : > { %2495 = vmatpush.msrb.mxu1 %v2471_v63  ;;  %v2753_v63 = vld [vmem:[#allocation40] sm:$0xff] }
 0x557   : > { %v2363_v39 = vmax.f32 %v2362_v38, 0.0  ;;  %v2630_v38 = vld [vmem:[#allocation37 + $0x18] sm:$0xff] }
 0x558   : > { %2496 = vmatpush.msrb.mxu1 %v2470_v1  ;;  %v5742_v1 = vld [vmem:[%s1907_s15] sm:$0xff] }
 0x559   : > { %3618 = vmatmul.msk.f32.vlgmr.msra.gmra.mxu1 %vm2073_vm5, %v2363_v39 }
 0x5ce   : > { %v2287_v44 = vpop.f32.mrf.mxu1 }
 0x5cf   : > { %v2288_v45 = vadd.f32 %v3934_v43, %v2287_v44 }
 0x5d1   : > { %v2290_v46 = vmax.f32 %v2288_v45, 0.0 }
 0x5d3   : > { %3615 = vmatmul.msk.f32.vlgmr.msrb.gmra.mxu2 %vm2073_vm5, %v2290_v46 }
 0x5d4   : > { %2525 = vmatpush.msrb.mxu2 %v2505_v2  ;;  %v5744_v2 = vld [vmem:[%s1907_s15 + $0x8] sm:$0xff] }
 0x5d6   : > { %v2384_v47 = vpop.f32.mrf.mxu1  ;;  %2526 = vmatpush.msrb.mxu2 %v2504_v9 }
 0x5d7   : > { %v2385_v48 = vadd.f32 %v3934_v43, %v2384_v47 }
 0x5d8   : > { %2527 = vmatpush.msrb.mxu2 %v2503_v10 }
 0x5d9   : > { %v2387_v49 = vmax.f32 %v2385_v48, 0.0 }
 0x5da   : > { %2528 = vmatpush.msrb.mxu2 %v2502_v11 }
 0x5db   : > { %3619 = vmatmul.msk.f32.vlgmr.msra.gmra.mxu2 %vm2073_vm5, %v2387_v49 }
 0x5dc   : > { %2650 = vmatpush.msra.mxu2 %v2630_v38 }
 0x5de   : > { %2651 = vmatpush.msra.mxu2 %v2629_v50 }
 0x5e0   : > { %2652 = vmatpush.msra.mxu2 %v2628_v51 }
 0x5e2   : > { %2653 = vmatpush.msra.mxu2 %v2627_v52 }
 0x656   : > { %v2319_v54 = vpop.f32.mrf.mxu2 }
 0x657   : > { %v2320_v56 = vadd.f32 %v3935_v55, %v2319_v54 }
 0x659   : > { %v2411_v58 = vrot.slane %v2320_v56, 7 }
 0x65e   : > { %v2408_v57 = vpop.f32.mrf.mxu2 }
 0x65f   : > { %v2409_v59 = vadd.f32 %v3935_v55, %v2408_v57 }
 0x661   : > { %v2412_v60 = vadd.f32 %v2411_v58, %v2409_v59 }
 0x663   : > { %3620 = vmatmul.msk.f32.vlgmr.msrb.gmra.mxu3 %vm2073_vm5, %v2412_v60  ;;  %v2756_v60 = vld [vmem:[#allocation40 + $0x18] sm:$0xff] }
 0x664   : > { %2670 = vmatpush.msrb.mxu3 %v2542_v12 }
 0x666   : > { %2671 = vmatpush.msrb.mxu3 %v2541_v18  ;;  %v2841_v18 = vld [vmem:[#allocation43 + $0x18] sm:$0xff] }
 0x668   : > { %2672 = vmatpush.msrb.mxu3 %v2540_v20 }
 0x66a   : > { %2673 = vmatpush.msrb.mxu3 %v2539_v23 }
 0x6e6   : > { %v2441_v5 = vpop.f32.mrf.mxu3 }
 0x6e7   : > { %v2462_v6 = vadd.f32 %v2461_v4, %v2441_v5  ;;  %v2871_v4 = vmul.f32 %v5744_v2, %v5744_v2 }
 0x6e9   : > { %v2468_v7 = vadd.f32 %v3936_v3, %v2462_v6  ;;  %v2870_v3 = vmul.f32 %v5742_v1, %v5742_v1  ;;  %v2875_v6 = vsel %vm1923_vm1, %v2871_v4, 0.0 }
 0x6ea   : > { %2876 = vadd.xlane.f32.xlu2 %v2875_v6  ;;  %v2964_v6 = vld [vmem:[#allocation45] sm:$0xff] }
 0x6eb   : > { %v2469_v8 = vmax.f32 %v2468_v7, 0.0  ;;  %v2872_v5 = vsel %vm1923_vm1, %v2870_v3, 0.0 }
 0x6ec   : > { %2873 = vadd.xlane.f32.xlu1 %v2872_v5 }
 0x6ed   : > { %3622 = vmatmul.msk.f32.vlgmr.msrb.gmra.mxu1 %vm2073_vm5, %v2469_v8  ;;  %v3941_v8 = vld [vmem:[%s5908_s6] ss:$0 sm:$0xff]  ;;  %s1912_s6 = scalar_lea.vmem %s5198_s3, %s5653_s8 }
 0x76a   : > { %v2498_v14 = vpop.f32.mrf.mxu1 }
 0x76b   : > { %v2499_v15 = vadd.f32 %v3937_v13, %v2498_v14  ;;  %v2809_v13 = vld [vmem:[#allocation42 + $0x18] sm:$0xff]  ;;  %v2808_v14 = vld [vmem:[#allocation42 + $0x10] sm:$0xff] }
 0x76d   : > { %v2501_v17 = vmax.f32 %v2499_v15, 0.0  ;;  %v2807_v15 = vld [vmem:[#allocation42 + $0x8] sm:$0xff] }
 0x76f   : > { %3623 = vmatmul.msk.f32.vlgmr.msrb.gmra.mxu2 %vm2073_vm5, %v2501_v17  ;;  %v2806_v17 = vld [vmem:[#allocation42] sm:$0xff] }
 0x770   : > { %2739 = vmatpush.msrb.mxu2 %v2630_v38  ;;  %v2840_v38 = vld [vmem:[#allocation43 + $0x10] sm:$0xff] }
 0x772   : > { %2740 = vmatpush.msrb.mxu2 %v2629_v50 }
 0x774   : > { %2741 = vmatpush.msrb.mxu2 %v2628_v51 }
 0x776   : > { %2742 = vmatpush.msrb.mxu2 %v2627_v52 }
 0x7f2   : > { %v2530_v27 = vpop.f32.mrf.mxu2 }
 0x7f3   : > { %v2531_v28 = vadd.f32 %v3938_v26, %v2530_v27  ;;  %v2874_v27 = vpop.xlane.xlu1 %2873 }
 0x7f5   : > { %v5723_v29 = vadd.f32 %v2531_v28, %v5700_v22  ;;  %v2598_v22 = vld [vmem:[#allocation34 + $0x18] sm:$0xff] }
 0x7f6   : > { %2618 = vmatpush.msra.mxu1 %v2598_v22 }
 0x7f7   : > { %3624 = vmatmul.msk.f32.vlgmr.msra.gmra.mxu3 %vm2073_vm5, %v5723_v29  ;;  %v2534_v30 = vrot.slane %v5723_v29, 1 }
 0x7f8   : > { %2619 = vmatpush.msra.mxu1 %v2597_v35  ;;  %2772 = vmatpush.msra.mxu3 %v2756_v60 }
 0x7f9   : > { %3625 = vmatmul.msk.f32.vlgmr.msra.gmra.mxu0 %vm2073_vm5, %v2534_v30 }
 0x7fa   : > { %2792 = vmatpush.msra.mxu0 %v2752_v31  ;;  %2620 = vmatpush.msra.mxu1 %v2596_v36 }
 0x7fb   : > { %2773 = vmatpush.msra.mxu3 %v2755_v61 }
 0x7fc   : > { %2793 = vmatpush.msra.mxu0 %v2751_v32  ;;  %2621 = vmatpush.msra.mxu1 %v2595_v37 }
 0x7fd   : > { %2774 = vmatpush.msra.mxu3 %v2754_v62 }
 0x7fe   : > { %2794 = vmatpush.msra.mxu0 %v2750_v33  ;;  %2715 = vmatpush.msrb.mxu1 %v2598_v22 }
 0x7ff   : > { %3628 = vmatmul.msk.f32.vlgmr.msrb.gmra.mxu3 %vm2073_vm5, %v2534_v30 }
 0x800   : > { %2795 = vmatpush.msra.mxu0 %v2749_v34  ;;  %2716 = vmatpush.msrb.mxu1 %v2597_v35  ;;  %v2877_v34 = vpop.xlane.xlu2 %2876 }
 0x801   : > { %3629 = vmatmul.msk.f32.vlgmr.msrb.gmra.mxu0 %vm2073_vm5, %v5723_v29  ;;  %2775 = vmatpush.msra.mxu3 %v2753_v63 }
 0x802   : > { %2717 = vmatpush.msrb.mxu1 %v2596_v36 }
 0x803   : > { %3636 = vmatpush.msk.msrb.mxu3 %vm1936_vm0, %v5657_v0 }
 0x804   : > { %2718 = vmatpush.msrb.mxu1 %v2595_v37 }
 0x809   : > { %3633 = vmatmul.msk.f32.vlgmr.msra.gmra.mxu0 %vm2073_vm5, %v5723_v29 }
 0x876   : > { %v2586_v39 = vpop.f32.mrf.mxu0 }
 0x87a   : > { %v2563_v41 = vpop.f32.mrf.mxu3 }
 0x87b   : > { %v2587_v42 = vadd.f32 %v2586_v39, %v2563_v41  ;;  %v2839_v39 = vld [vmem:[#allocation43 + $0x8] sm:$0xff]  ;;  %v3943_v41 = vld [vmem:[%s5910_s16] ss:$0 sm:$0xff] }
 0x87d   : > { %v2593_v43 = vadd.f32 %v3939_v40, %v2587_v42 }
 0x87e   : > { %v2695_v45 = vpop.f32.mrf.mxu0 }
 0x87f   : > { %v2594_v44 = vmax.f32 %v2593_v43, 0.0 }
 0x881   : > { %3626 = vmatmul.msk.f32.vlgmr.msra.gmra.mxu1 %vm2073_vm5, %v2594_v44 }
 0x882   : > { %v2675_v46 = vpop.f32.mrf.mxu3  ;;  %2829 = vmatpush.msra.mxu1 %v2809_v13  ;;  %v3945_v13 = vld [vmem:[%s5913_s5] ss:$0 sm:$0xff] }
 0x883   : > { %v2696_v47 = vadd.f32 %v2695_v45, %v2675_v46 }
 0x884   : > { %2830 = vmatpush.msra.mxu1 %v2808_v14 }
 0x885   : > { %v2698_v48 = vadd.f32 %v3939_v40, %v2696_v47  ;;  %v2838_v40 = vld [vmem:[#allocation43] sm:$0xff] }
 0x886   : > { %2831 = vmatpush.msra.mxu1 %v2807_v15  ;;  %v2797_v20 = vpop.f32.mrf.mxu0 }
 0x887   : > { %v2699_v49 = vmax.f32 %v2698_v48, 0.0 }
 0x888   : > { %2832 = vmatpush.msra.mxu1 %v2806_v17 }
 0x889   : > { %3630 = vmatmul.msk.f32.vlgmr.msrb.gmra.mxu1 %vm2073_vm5, %v2699_v49 }
 0x8fe   : > { %v2623_v54 = vpop.f32.mrf.mxu1 }
 0x8ff   : > { %v2624_v55 = vadd.f32 %v3940_v53, %v2623_v54  ;;  %v2967_v54 = vld [vmem:[#allocation45 + $0x18] sm:$0xff] }
 0x901   : > { %v2626_v56 = vmax.f32 %v2624_v55, 0.0  ;;  %v2966_v55 = vld [vmem:[#allocation45 + $0x10] sm:$0xff] }
 0x903   : > { %3627 = vmatmul.msk.f32.vlgmr.msra.gmra.mxu2 %vm2073_vm5, %v2626_v56  ;;  %v2965_v56 = vld [vmem:[#allocation45 + $0x8] sm:$0xff] }
 0x904   : > { %2861 = vmatpush.msra.mxu2 %v2841_v18 }
 0x906   : > { %v2720_v57 = vpop.f32.mrf.mxu1  ;;  %2862 = vmatpush.msra.mxu2 %v2840_v38 }
 0x907   : > { %v2721_v58 = vadd.f32 %v3940_v53, %v2720_v57 }
 0x908   : > { %2863 = vmatpush.msra.mxu2 %v2839_v39 }
 0x909   : > { %v2723_v59 = vmax.f32 %v2721_v58, 0.0  ;;  %v3944_v58 = vld [vmem:[%s5911_s13] ss:$0 sm:$0xff] }
 0x90a   : > { %2864 = vmatpush.msra.mxu2 %v2838_v40 }
 0x90b   : > { %3631 = vmatmul.msk.f32.vlgmr.msrb.gmra.mxu2 %vm2073_vm5, %v2723_v59 }
 0x90c   : > { %3013 = vmatpush.msrb.mxu2 %v2967_v54 }
 0x90e   : > { %3014 = vmatpush.msrb.mxu2 %v2966_v55 }
 0x910   : > { %3015 = vmatpush.msrb.mxu2 %v2965_v56 }
 0x912   : > { %3016 = vmatpush.msrb.mxu2 %v2964_v6 }
 0x986   : > { %v2655_v7 = vpop.f32.mrf.mxu2 }
 0x987   : > { %v2656_v0 = vadd.f32 %v3941_v8, %v2655_v7  ;;  %v2968_v7 = vld [vmem:[%s5912_s0] sm:$0xf] }
 0x988   : > { %3641 = vmatpush.msk.msrb.mxu1 %vm1936_vm0, %v2968_v7 }
 0x989   : > { %v2747_v10 = vrot.slane %v2656_v0, 7 }
 0x98e   : > { %v2744_v9 = vpop.f32.mrf.mxu2 }
 0x98f   : > { %v2745_v11 = vadd.f32 %v3941_v8, %v2744_v9  ;;  %v3035_v8 = vld [vmem:[#allocation46 + $0x18] sm:$0xff]  ;;  %v3034_v9 = vld [vmem:[#allocation46 + $0x10] sm:$0xff] }
 0x991   : > { %v2748_v12 = vadd.f32 %v2747_v10, %v2745_v11  ;;  %v3033_v10 = vld [vmem:[#allocation46 + $0x8] sm:$0xff]  ;;  %v3032_v11 = vld [vmem:[#allocation46] sm:$0xff] }
 0x993   : > { %3632 = vmatmul.msk.f32.vlgmr.msra.gmra.mxu3 %vm2073_vm5, %v2748_v12 }
 0x994   : > { %3058 = vmatpush.msra.mxu3 %v3035_v8 }
 0x996   : > { %3059 = vmatpush.msra.mxu3 %v3034_v9 }
 0x998   : > { %3060 = vmatpush.msra.mxu3 %v3033_v10 }
 0x99a   : > { %3061 = vmatpush.msra.mxu3 %v3032_v11 }
 0x99b   : > { %3637 = vmatmul.msk.f32.vlgmr.msrb.gmra.mxu3 %vm1923_vm1, %v5742_v1 }
 0x9a3   : > { %3638 = vmatmul.msk.f32.gmra.mxu3 %vm1923_vm1, %v5744_v2 }
 0xa16   : > { %v2777_v21 = vpop.f32.mrf.mxu3 }
 0xa17   : > { %v2798_v23 = vadd.f32 %v2797_v20, %v2777_v21 }
 0xa19   : > { %v2804_v24 = vadd.f32 %v3942_v19, %v2798_v23 }
 0xa1b   : > { %v2805_v25 = vmax.f32 %v2804_v24, 0.0  ;;  %v3073_v24 = vld [vmem:[%s5188_s24 + $0x10] sm:$0xff] }
 0xa1d   : > { %3634 = vmatmul.msk.f32.vlgmr.msra.gmra.mxu1 %vm2073_vm5, %v2805_v25  ;;  %v3072_v25 = vld [vmem:[%s5188_s24 + $0x8] sm:$0xff] }
 0xa1e   : > { %v2901_v26 = vpop.f32.mrf.mxu3 }
 0xa1f   : > { %v2907_v28 = vmul.f32 2.0, %v2901_v26  ;;  %v3071_v26 = vld [vmem:[%s5188_s24] sm:$0xff] }
 0xa21   : > { %v2909_v30 = vsub.f32 %v2907_v28, %v2874_v27  ;;  %v3946_v27 = vld [vmem:[%s5183_s4] ss:$0 sm:$0xff] }
 0xa23   : > { %v2911_v31 = vsub.f32 %v2909_v30, %v5672_v16 }
 0xa25   : > { %v2913_v32 = vsel %vm1972_vm4, %v2911_v31, -inf  ;;  %3642 = vmatmul.msk.f32.vlgmr.msrb.gmra.mxu1 %vm1923_vm1, %v5742_v1  ;;  %v3074_v1 = vld [vmem:[%s5188_s24 + $0x18] sm:$0xff] }
 0xa26   : > { %v2904_v33 = vpop.f32.mrf.mxu3  ;;  %2914 = vmax.xlane.f32.xlu1 %v2913_v32 }
 0xa27   : > { %v2908_v22 = vmul.f32 2.0, %v2904_v33 }
 0xa29   : > { %v2910_v35 = vsub.f32 %v2908_v22, %v2877_v34  ;;  %v3947_v22 = vld [vmem:[%s5193_s17] ss:$0 sm:$0xff] }
 0xa2b   : > { %v2912_v36 = vsub.f32 %v2910_v35, %v5672_v16 }
 0xa2d   : > { %v2916_v37 = vsel %vm1972_vm4, %v2912_v36, -inf  ;;  %3643 = vmatmul.msk.f32.gmra.mxu1 %vm1923_vm1, %v5744_v2 }
 0xa2e   : > { %2917 = vmax.xlane.f32.xlu2 %v2916_v37 }
 0xa99   : > { %v2915_v42 = vpop.xlane.xlu1 %2914 }
 0xa9a   : > { %v2919_v43 = vsub.f32 %v2911_v31, %v2915_v42  ;;  %v2834_v44 = vpop.f32.mrf.mxu1 }
 0xa9b   : > { %v2835_v45 = vadd.f32 %v3943_v41, %v2834_v44 }
 0xa9c   : > { %v2921_v46 = vmul.f32 1.442695, %v2919_v43 }
 0xa9d   : > { %v2837_v47 = vmax.f32 %v2835_v45, 0.0 }
 0xa9e   : > { %3956 = vpow2.f32 %v2921_v46 }
 0xa9f   : > { %3635 = vmatmul.msk.f32.vlgmr.msra.gmra.mxu2 %vm2073_vm5, %v2837_v47 }
 0xaa1   : > { %v2918_v16 = vpop.xlane.xlu2 %2917 }
 0xaa2   : > { %v2920_v48 = vsub.f32 %v2912_v36, %v2918_v16  ;;  %v2989_v12 = vpop.f32.mrf.mxu1 }
 0xaa4   : > { %v3957_v49 = vpop.eup %3956  ;;  %v2923_v50 = vmul.f32 1.442695, %v2920_v48 }
 0xaa5   : > { %v2925_v51 = vsel %vm1972_vm4, %v3957_v49, 0.0 }
 0xaa6   : > { %3958 = vpow2.f32 %v2923_v50  ;;  %2926 = vadd.xlane.f32.xlu1 %v2925_v51 }
 0xaaa   : > { %v2992_v18 = vpop.f32.mrf.mxu1 }
 0xaac   : > { %v3959_v52 = vpop.eup %3958 }
 0xaad   : > { %v2928_v53 = vsel %vm1972_vm4, %v3959_v52, 0.0 }
 0xaae   : > { %2929 = vadd.xlane.f32.xlu2 %v2928_v53 }
 0xb19   : > { %v2927_v57 = vpop.xlane.xlu1 %2926 }
 0xb1a   : > { %3960 = vrcp.f32 %v2927_v57 }
 0xb20   : > { %v3961_v61 = vpop.eup %3960 }
 0xb21   : > { %v2930_v59 = vpop.xlane.xlu2 %2929  ;;  %v2933_v3 = vmul.f32 %v3961_v61, %v3957_v49 }
 0xb22   : > { %v2866_v60 = vpop.f32.mrf.mxu2  ;;  %3962 = vrcp.f32 %v2930_v59 }
 0xb23   : > { %v2867_v62 = vadd.f32 %v3944_v58, %v2866_v60 }
 0xb25   : > { %v2869_v63 = vadd.f32 %v2867_v62, %v5723_v29 }
 0xb27   : > { %2956 = vmatpush.msrb.mxu0 %v2869_v63 }
 0xb28   : > { %3639 = vmatmul.msk.f32.vlgmr.msrb.gmra.mxu0 %vm1972_vm4, %v2933_v3  ;;  %v3963_v4 = vpop.eup %3962 }
 0xb29   : > { %v2934_v5 = vmul.f32 %v3963_v4, %v3959_v52  ;;  %3097 = vmatpush.msra.mxu0 %v3074_v1 }
 0xb2b   : > { %3098 = vmatpush.msra.mxu0 %v3073_v24 }
 0xb2d   : > { %3099 = vmatpush.msra.mxu0 %v3072_v25 }
 0xb2f   : > { %3100 = vmatpush.msra.mxu0 %v3071_v26 }
 0xb30   : > { %3640 = vmatmul.msk.f32.gmra.mxu0 %vm1972_vm4, %v2934_v5 }
 0xba5   : > { %v2958_v29 = vpop.f32.mrf.mxu0 }
 0xba6   : > { %3644 = vmatmul.msk.f32.vlgmr.msrb.gmra.mxu2 %vm2073_vm5, %v2958_v29 }
 0xbad   : > { %v2961_v0 = vpop.f32.mrf.mxu0 }
 0xbae   : > { %3645 = vmatmul.msk.f32.gmra.mxu2 %vm2073_vm5, %v2961_v0 }
 0xc29   : > { %v3018_v2 = vpop.f32.mrf.mxu2 }
 0xc2a   : > { %v3019_v14 = vadd.f32 %v3018_v2, %v2989_v12 }
 0xc2c   : > { %v3028_v15 = vadd.f32 %v3945_v13, %v3019_v14 }
 0xc2e   : > { %v3030_v17 = vmax.f32 %v3028_v15, 0.0 }
 0xc30   : > { %3646 = vmatmul.msk.f32.vlgmr.msra.gmra.mxu3 %vm2073_vm5, %v3030_v17 }
 0xc31   : > { %v3021_v19 = vpop.f32.mrf.mxu2 }
 0xc32   : > { %v3022_v20 = vadd.f32 %v3021_v19, %v2992_v18 }
 0xc34   : > { %v3029_v21 = vadd.f32 %v3945_v13, %v3022_v20 }
 0xc36   : > { %v3031_v23 = vmax.f32 %v3029_v21, 0.0 }
 0xc38   : > { %3647 = vmatmul.msk.f32.gmra.mxu3 %vm2073_vm5, %v3031_v23 }
 0xcb3   : > { %v3063_v28 = vpop.f32.mrf.mxu3 }
 0xcb4   : > { %v3064_v30 = vadd.f32 %v3946_v27, %v3063_v28 }
 0xcb6   : > { %v3069_v31 = vmax.f32 %v3064_v30, 0.0 }
 0xcb8   : > { %3648 = vmatmul.msk.f32.vlgmr.msra.gmra.mxu0 %vm2073_vm5, %v3069_v31 }
 0xcbb   : > { %v3066_v32 = vpop.f32.mrf.mxu3 }
 0xcbc   : > { %v3067_v33 = vadd.f32 %v3946_v27, %v3066_v32 }
 0xcbe   : > { %v3070_v34 = vmax.f32 %v3067_v33, 0.0 }
 0xcc0   : > { %3649 = vmatmul.msk.f32.gmra.mxu0 %vm2073_vm5, %v3070_v34 }
 0xd35   : > { %v3102_v35 = vpop.f32.mrf.mxu0 }
 0xd36   : > { %v3103_v36 = vadd.f32 %v3947_v22, %v3102_v35 }
 0xd38   : > { %3109 = vst.msk [vmem:[%s1912_s6] sm:$0xff] %vm3108_vm7, %v3103_v36 }
 0xd3d   : > { %v3105_v37 = vpop.f32.mrf.mxu0 }
 0xd3e   : > { %v3106_v38 = vadd.f32 %v3947_v22, %v3105_v37 }
 0xd40   : > { %3110 = vst.msk [vmem:[%s1912_s6 + $0x8] sm:$0xff] %vm3108_vm7, %v3106_v38 }
 0xd41 PF: > { %s121_s22 = sadd.s32 1, %s4874_s22  }
 0xd42   : > { %p118_p3 = scmp.ge.s32.totalorder %s121_s22, 4  }
 0xd44   :  { %120 = sbr.rel (!%p118_p3) target bundleno = 102 (0x66), region = 412 }
 0xd49   :  { %3132 = vsyncpa [#allocation3], 1 }
 0xd4a   :  { %3134 = vsyncpa [#allocation3 + $0x1], 1 }
 0xd4b   :  { %3135 = vsyncpa [#allocation5], 1 }
 0xd4c   :  { %3136 = vsyncpa [#allocation8], 1 }
 0xd4d   :  { %3137 = vsyncpa [#allocation11], 1 }
 0xd4e   :  { %3138 = vsyncpa [#allocation14], 1 }
 0xd4f   :  { %3139 = vsyncpa [#allocation17], 1 }
 0xd50   :  { %3140 = vsyncpa [#allocation20], 1 }
 0xd51   :  { %3141 = vsyncpa [#allocation23], 1 }
 0xd52   :  { %3142 = vsyncpa [#allocation26], 1 }
 0xd53   :  { %3143 = vsyncpa [#allocation29], 1 }
 0xd54   :  { %3144 = vsyncpa [#allocation32], 1 }
 0xd55   :  { %3145 = vsyncpa [#allocation35], 1 }
 0xd56   :  { %3146 = vsyncpa [#allocation38], 1 }
 0xd57   :  { %3147 = vsyncpa [#allocation41], 1 }
 0xd58   :  { %3148 = vsyncpa [#allocation44], 1 }
 0xd59   :  { %3149 = vsyncpa [#allocation47], 1 }

</bundles_post_ra>
